<compile_context>
chip_gen: v7x
topology: tpu7x:2x2x1
jax: 0.10.0
libtpu: 0.0.40
codegen_flags: <defaults>
</compile_context>

<pallas_src>
import functools

import jax
import jax.numpy as jnp
from jax import lax
from jax.experimental import pallas as pl
from jax.experimental.pallas import tpu as pltpu


LANE = 128  # TPU lane width; channel dims are padded to a multiple of this.


def _round_up(x, m):
    return ((x + m - 1) // m) * m


# ------------------------------ fused kernel ------------------------------- #

def _bottleneck_kernel(x_ref, w1_ref, b1_ref, w2_ref, b2_ref, w3_ref, b3_ref,
                       *rest, stride, downsampling):
    """Whole bottleneck for a batch-block of images, entirely in VMEM.

    x_ref  : (NB, H, W, Cin)      activations (compute dtype: f32 or bf16)
    w1_ref : (Cin, P)             1x1 conv weight, BN scale pre-folded
    w2_ref : (9*P, P)             3x3 conv im2col weight, BN scale pre-folded
    w3_ref : (P, Cout)            1x1 conv weight, BN scale pre-folded
    b*_ref : (1, C)               folded BN biases (f32)
    wd/bd  : optional residual-projection weights (downsampling branch)
    o_ref  : (NB, Ho, Wo, Cout)
    pad_ref: VMEM scratch (NB, H+2, W+2, P), compute dtype, zero halo border
    col_ref: VMEM scratch (NB, Ho, Wo, 9*P), compute dtype, im2col slab
    """
    if downsampling:
        wd_ref, bd_ref, o_ref, pad_ref, col_ref = rest
    else:
        o_ref, pad_ref, col_ref = rest

    NB, H, W, Cin = x_ref.shape
    P = w1_ref.shape[1]
    Cout = w3_ref.shape[1]
    _, Ho, Wo, _ = o_ref.shape
    cdt = x_ref.dtype                       # MXU operand dtype (f32 or bf16)

    # Zero the halo border ONCE: the scratch persists across grid steps, the
    # interior [1:H+1, 1:W+1] is fully overwritten every step, and only the
    # 1-wide border must remain zero.
    @pl.when(pl.program_id(0) == 0)
    def _():
        pad_ref[...] = jnp.zeros_like(pad_ref)

    # ---- conv1 (1x1) + folded-BN bias + ReLU (f32 epilogue) ----------------
    y1 = jnp.dot(x_ref[...].reshape(NB * H * W, Cin), w1_ref[...],
                 preferred_element_type=jnp.float32)
    y1 = jnp.maximum(y1 + b1_ref[...], 0.0)
    # Single cast into the compute-dtype halo scratch (no per-tap casts).
    pad_ref[:, 1:H + 1, 1:W + 1, :] = y1.reshape(NB, H, W, P).astype(cdt)

    # ---- conv2 (3x3, pad=1, stride) as ONE im2col matmul -------------------
    # Build the (NB, Ho, Wo, 9*P) slab with 9 ref-slice copies (lane-aligned
    # channel blocks), then a single (NB*Ho*Wo, 9P) @ (9P, P) matmul.
    for kh in range(3):
        for kw in range(3):
            t = kh * 3 + kw
            if stride == 1:
                tap = pad_ref[:, kh:kh + Ho, kw:kw + Wo, :]
            else:
                # Strided im2col built once per tap (strided VMEM reads).
                tap = pad_ref[:, pl.ds(kh, Ho, stride), pl.ds(kw, Wo, stride), :]
            col_ref[:, :, :, t * P:(t + 1) * P] = tap
    y2 = jnp.dot(col_ref[...].reshape(NB * Ho * Wo, 9 * P), w2_ref[...],
                 preferred_element_type=jnp.float32)
    y2 = jnp.maximum(y2 + b2_ref[...], 0.0).astype(cdt)

    # ---- conv3 (1x1) + bias + residual + ReLU ------------------------------
    y3 = jnp.dot(y2, w3_ref[...], preferred_element_type=jnp.float32)
    y3 = y3 + b3_ref[...]

    # Residual is (re)read from the VMEM-resident input tile at the epilogue
    # (keeps vreg live ranges short; no HBM reread).
    if downsampling:
        if stride == 1:
            xs = x_ref[...].reshape(NB * H * W, Cin)
        else:
            xs = x_ref[:, pl.ds(0, Ho, stride), pl.ds(0, Wo, stride), :]
            xs = xs.reshape(NB * Ho * Wo, Cin)
        res = jnp.dot(xs, wd_ref[...], preferred_element_type=jnp.float32)
        res = res + bd_ref[...]
    else:
        res = x_ref[...].reshape(NB * H * W, Cin).astype(jnp.float32)

    out = jnp.maximum(y3 + res, 0.0)
    o_ref[...] = out.reshape(NB, Ho, Wo, Cout).astype(o_ref.dtype)


# --------------------------------- wrappers --------------------------------- #

def bottleneck_forward_nhwc(x, params, stride=1, downsampling=False,
                            compute_dtype=jnp.float32, batch_block=1,
                            lane_multiple=LANE):
    """Pallas Bottleneck forward on NHWC activations (eval-mode BatchNorm).

    compute_dtype selects MXU operand precision (f32 or bf16); accumulation
    and the bias/ReLU/residual epilogue stay f32.  Channel dims are zero-
    padded to a multiple of `lane_multiple` (no-op when already aligned).
    """
    if stride != 1 and not downsampling:
        raise ValueError("stride > 1 requires downsampling=True (residual "
                         "spatial mismatch, same constraint as PyTorch).")

    N, H, W, Cin = x.shape
    P = params["w1"].shape[1]
    Cout = params["w3"].shape[1]
    if not downsampling and Cin != Cout:
        raise ValueError("identity residual requires in_places == places*expansion")
    if N % batch_block != 0:
        raise ValueError("batch must be divisible by batch_block")
    NB = batch_block
    Ho = (H + 2 - 3) // stride + 1
    Wo = (W + 2 - 3) // stride + 1
    out_dtype = x.dtype
    cdt = compute_dtype

    # Lane-dense channel padding (zero weights/bias/activations contribute 0).
    Cin_p = _round_up(Cin, lane_multiple)
    P_p = _round_up(P, lane_multiple)
    Cout_p = _round_up(Cout, lane_multiple)

    def pad2(a, r, c):
        return jnp.pad(a, ((0, r - a.shape[0]), (0, c - a.shape[1])))

    # Fold eval-mode BN scale into the conv weights; keep f32 biases.
    w1 = pad2(params["w1"] * params["s1"], Cin_p, P_p).astype(cdt)
    w3 = pad2(params["w3"] * params["s3"], P_p, Cout_p).astype(cdt)
    w2 = params["w2"] * params["s2"][None]                       # (9, P, P)
    w2 = jnp.pad(w2, ((0, 0), (0, P_p - P), (0, P_p - P)))
    w2 = w2.reshape(9 * P_p, P_p).astype(cdt)                    # im2col layout
    b1 = jnp.pad(params["b1"], ((0, 0), (0, P_p - P))).astype(jnp.float32)
    b2 = jnp.pad(params["b2"], ((0, 0), (0, P_p - P))).astype(jnp.float32)
    b3 = jnp.pad(params["b3"], ((0, 0), (0, Cout_p - Cout))).astype(jnp.float32)

    xk = jnp.pad(x, ((0, 0), (0, 0), (0, 0), (0, Cin_p - Cin))).astype(cdt)

    args = [xk, w1, b1, w2, b2, w3, b3]
    in_specs = [
        pl.BlockSpec((NB, H, W, Cin_p), lambda n: (n, 0, 0, 0)),
        pl.BlockSpec((Cin_p, P_p), lambda n: (0, 0)),
        pl.BlockSpec((1, P_p), lambda n: (0, 0)),
        pl.BlockSpec((9 * P_p, P_p), lambda n: (0, 0)),
        pl.BlockSpec((1, P_p), lambda n: (0, 0)),
        pl.BlockSpec((P_p, Cout_p), lambda n: (0, 0)),
        pl.BlockSpec((1, Cout_p), lambda n: (0, 0)),
    ]
    if downsampling:
        wd = pad2(params["wd"] * params["sd"], Cin_p, Cout_p).astype(cdt)
        bd = jnp.pad(params["bd"], ((0, 0), (0, Cout_p - Cout))).astype(jnp.float32)
        args += [wd, bd]
        in_specs += [
            pl.BlockSpec((Cin_p, Cout_p), lambda n: (0, 0)),
            pl.BlockSpec((1, Cout_p), lambda n: (0, 0)),
        ]

    flops = 2 * N * (H * W * Cin_p * P_p
                     + Ho * Wo * 9 * P_p * P_p
                     + Ho * Wo * P_p * Cout_p
                     + (Ho * Wo * Cin_p * Cout_p if downsampling else 0))
    bytes_accessed = (xk.size * xk.dtype.itemsize
                      + N * Ho * Wo * Cout_p * jnp.dtype(out_dtype).itemsize
                      + sum(int(a.size) * a.dtype.itemsize for a in args[1:]))

    kernel = functools.partial(_bottleneck_kernel, stride=stride,
                               downsampling=downsampling)

    out = pl.pallas_call(
        kernel,
        grid=(N // NB,),
        in_specs=in_specs,
        out_specs=pl.BlockSpec((NB, Ho, Wo, Cout_p), lambda n: (n, 0, 0, 0)),
        out_shape=jax.ShapeDtypeStruct((N, Ho, Wo, Cout_p), out_dtype),
        scratch_shapes=[pltpu.VMEM((NB, H + 2, W + 2, P_p), cdt),
                        pltpu.VMEM((NB, Ho, Wo, 9 * P_p), cdt)],
        compiler_params=pltpu.CompilerParams(
            dimension_semantics=("parallel",),
            vmem_limit_bytes=48 * 1024 * 1024),   # <= ~48 MiB: safe on v7x
        cost_estimate=pl.CostEstimate(flops=flops, transcendentals=0,
                                      bytes_accessed=bytes_accessed),
    )(*args)

    if Cout_p != Cout:
        out = out[..., :Cout]
    return out


def bottleneck_forward(x_nchw, params, stride=1, downsampling=False,
                       compute_dtype=jnp.float32, batch_block=1):
    """NCHW interface for parity with the PyTorch module.

    NOTE: each transpose below is a full-tensor HBM read+write outside the
    kernel; in a real network keep activations NHWC end-to-end and call
    bottleneck_forward_nhwc directly.
    """
    x = jnp.transpose(x_nchw, (0, 2, 3, 1))
    out = bottleneck_forward_nhwc(x, params, stride=stride,
                                  downsampling=downsampling,
                                  compute_dtype=compute_dtype,
                                  batch_block=batch_block)
    return jnp.transpose(out, (0, 3, 1, 2))


# ----------------------------- param construction --------------------------- #

def _fold_bn(gamma, beta, mean, var, eps=1e-5):
    scale = gamma / jnp.sqrt(var + eps)
    bias = beta - mean * scale
    return scale.reshape(1, -1), bias.reshape(1, -1)


def make_params(key, in_places, places, expansion=4, downsampling=False):
    ks = list(jax.random.split(key, 20))
    exp_out = places * expansion

    def bn_params(k, c):
        k1, k2, k3, k4 = jax.random.split(k, 4)
        gamma = 1.0 + 0.1 * jax.random.normal(k1, (c,), jnp.float32)
        beta = 0.1 * jax.random.normal(k2, (c,), jnp.float32)
        mean = 0.1 * jax.random.normal(k3, (c,), jnp.float32)
        var = 1.0 + 0.1 * jax.random.uniform(k4, (c,), jnp.float32)
        return _fold_bn(gamma, beta, mean, var)

    p = {}
    p["w1"] = 0.1 * jax.random.normal(ks[0], (in_places, places), jnp.float32)
    p["s1"], p["b1"] = bn_params(ks[1], places)
    p["w2"] = 0.1 * jax.random.normal(ks[2], (9, places, places), jnp.float32)
    p["s2"], p["b2"] = bn_params(ks[3], places)
    p["w3"] = 0.1 * jax.random.normal(ks[4], (places, exp_out), jnp.float32)
    p["s3"], p["b3"] = bn_params(ks[5], exp_out)
    if downsampling:
        p["wd"] = 0.1 * jax.random.normal(ks[6], (in_places, exp_out), jnp.float32)
        p["sd"], p["bd"] = bn_params(ks[7], exp_out)
    return p


# -------------------------------- pure-JAX ref ------------------------------- #

def reference_forward(x_nchw, params, stride=1, downsampling=False):
    x = jnp.transpose(x_nchw, (0, 2, 3, 1))
    dn = ("NHWC", "HWIO", "NHWC")

    def bn(y, s, b):
        return y * s.reshape(1, 1, 1, -1) + b.reshape(1, 1, 1, -1)

    cin = x.shape[-1]
    P = params["w1"].shape[1]
    y = lax.conv_general_dilated(x, params["w1"].reshape(1, 1, cin, P),
                                 (1, 1), "VALID", dimension_numbers=dn)
    y = jax.nn.relu(bn(y, params["s1"], params["b1"]))
    w2 = params["w2"].reshape(3, 3, P, P)
    # Explicit symmetric padding (1,1) to match PyTorch padding=1 exactly
    # (XLA "SAME" pads asymmetrically for stride>1).
    y = lax.conv_general_dilated(y, w2, (stride, stride), ((1, 1), (1, 1)),
                                 dimension_numbers=dn)
    y = jax.nn.relu(bn(y, params["s2"], params["b2"]))
    Co = params["w3"].shape[1]
    y = lax.conv_general_dilated(y, params["w3"].reshape(1, 1, P, Co),
                                 (1, 1), "VALID", dimension_numbers=dn)
    y = bn(y, params["s3"], params["b3"])
    if downsampling:
        r = lax.conv_general_dilated(x, params["wd"].reshape(1, 1, cin, Co),
                                     (stride, stride), "VALID",
                                     dimension_numbers=dn)
        r = bn(r, params["sd"], params["bd"])
    else:
        r = x
    out = jax.nn.relu(y + r)
    return jnp.transpose(out, (0, 3, 1, 2))


# ------------------------------------ main ----------------------------------- #

if __name__ == "__main__":
    # Bottleneck(in_places=16, places=4, expansion=4)
    in_places, places, expansion = 16, 4, 4
    N, H, W = 2, 8, 8

    key = jax.random.PRNGKey(0)
    kx, kp, kp2 = jax.random.split(key, 3)
    x = jax.random.normal(kx, (N, in_places, H, W), jnp.float32)   # NCHW input

    params = make_params(kp, in_places, places, expansion, downsampling=False)
    params_d = make_params(kp2, in_places, places, expansion, downsampling=True)

    # case 1: default config (stride=1, identity residual), f32 — tight check.
    out = jax.block_until_ready(bottleneck_forward(x, params))
    ref = reference_forward(x, params)
    assert out.shape == (N, places * expansion, H, W)
    assert jnp.allclose(out, ref, atol=1e-4, rtol=1e-4), "f32 mismatch vs reference"

    # case 2: downsampling projection, stride=1, two images per grid step.
    out_d = jax.block_until_ready(
        bottleneck_forward(x, params_d, downsampling=True, batch_block=2))
    ref_d = reference_forward(x, params_d, downsampling=True)
    assert jnp.allclose(out_d, ref_d, atol=1e-4, rtol=1e-4), "downsample mismatch"

    # case 3: stride=2 downsampling stage (strided-im2col path), f32.
    out_s = jax.block_until_ready(
        bottleneck_forward(x, params_d, stride=2, downsampling=True))
    ref_s = reference_forward(x, params_d, stride=2, downsampling=True)
    assert out_s.shape == (N, places * expansion, H // 2, W // 2)
    assert jnp.allclose(out_s, ref_s, atol=1e-4, rtol=1e-4), "stride-2 mismatch"

    # case 4: bf16 MXU operands, f32 accumulation — loose check vs f32 ref.
    out_bf16 = jax.block_until_ready(
        bottleneck_forward(x, params, compute_dtype=jnp.bfloat16))
    assert jnp.allclose(out_bf16, ref, atol=5e-2, rtol=5e-2), "bf16 mismatch"

    print("KERNEL_OK")
</pallas_src>

<mosaic_0001>
module attributes {stable_mosaic.version = 11 : i64} {
  func.func @_bottleneck_kernel(%arg0: i32, %arg1: memref<1x8x8x128xf32, #tpu.memory_space<vmem>>, %arg2: memref<128x128xf32, #tpu.memory_space<vmem>>, %arg3: memref<1x128xf32, #tpu.memory_space<vmem>>, %arg4: memref<1152x128xf32, #tpu.memory_space<vmem>>, %arg5: memref<1x128xf32, #tpu.memory_space<vmem>>, %arg6: memref<128x128xf32, #tpu.memory_space<vmem>>, %arg7: memref<1x128xf32, #tpu.memory_space<vmem>>, %arg8: memref<1x8x8x128xf32, #tpu.memory_space<vmem>>, %arg9: memref<1x10x10x128xf32, #tpu.memory_space<vmem>>, %arg10: memref<1x8x8x1152xf32, #tpu.memory_space<vmem>>) attributes {dimension_semantics = [#tpu.dimension_semantics<parallel>], iteration_bounds = array<i64: 2>, scalar_prefetch = 0 : i64, scratch_operands = 2 : i64, tpu.core_type = #tpu.core_type<tc>, window_params = [{transform_indices = @transform_0, window_bounds = array<i64: 1, 8, 8, 128>}, {pipeline_mode = #tpu.pipeline_mode<synchronous>, transform_indices = @transform_1, window_bounds = array<i64: 128, 128>}, {pipeline_mode = #tpu.pipeline_mode<synchronous>, transform_indices = @transform_2, window_bounds = array<i64: 1, 128>}, {pipeline_mode = #tpu.pipeline_mode<synchronous>, transform_indices = @transform_3, window_bounds = array<i64: 1152, 128>}, {pipeline_mode = #tpu.pipeline_mode<synchronous>, transform_indices = @transform_4, window_bounds = array<i64: 1, 128>}, {pipeline_mode = #tpu.pipeline_mode<synchronous>, transform_indices = @transform_5, window_bounds = array<i64: 128, 128>}, {pipeline_mode = #tpu.pipeline_mode<synchronous>, transform_indices = @transform_6, window_bounds = array<i64: 1, 128>}, {transform_indices = @transform_7, window_bounds = array<i64: 1, 8, 8, 128>}]} {
    %c0_i32 = arith.constant 0 : i32
    %0 = arith.cmpi eq, %arg0, %c0_i32 : i32
    %1 = arith.extui %0 : i1 to i32
    %c0_i32_0 = arith.constant 0 : i32
    %2 = arith.cmpi ne, %1, %c0_i32_0 : i32
    scf.if %2 {
      %cst_99 = arith.constant 0.000000e+00 : f32
      %53 = vector.broadcast %cst_99 : f32 to vector<1x10x10x128xf32>
      %c0_100 = arith.constant 0 : index
      %c0_101 = arith.constant 0 : index
      %c0_102 = arith.constant 0 : index
      %c0_103 = arith.constant 0 : index
      %54 = vector.load %arg9[%c0_100, %c0_101, %c0_102, %c0_103] : memref<1x10x10x128xf32, #tpu.memory_space<vmem>>, vector<1x10x10x128xf32>
      tpu.vector_store %arg9[%c0_100, %c0_101, %c0_102, %c0_103], %53 {strides = array<i32>} : memref<1x10x10x128xf32, #tpu.memory_space<vmem>>, vector<1x10x10x128xf32>,
    } else {
    }
    %c0 = arith.constant 0 : index
    %c0_1 = arith.constant 0 : index
    %c0_2 = arith.constant 0 : index
    %c0_3 = arith.constant 0 : index
    %3 = vector.load %arg1[%c0, %c0_1, %c0_2, %c0_3] : memref<1x8x8x128xf32, #tpu.memory_space<vmem>>, vector<1x8x8x128xf32>
    %4 = vector.shape_cast %3 : vector<1x8x8x128xf32> to vector<64x128xf32>
    %c0_4 = arith.constant 0 : index
    %c0_5 = arith.constant 0 : index
    %5 = vector.load %arg2[%c0_4, %c0_5] : memref<128x128xf32, #tpu.memory_space<vmem>>, vector<128x128xf32>
    %cst = arith.constant dense<0.000000e+00> : vector<64x128xf32>
    %6 = tpu.matmul %4, %5, %cst {dimension_numbers = #tpu.dot_dimension_numbers<[1], [0], [0], [1], [0, 0, 1, 1], [], []>} : vector<64x128xf32>, vector<128x128xf32>, vector<64x128xf32> -> vector<64x128xf32>
    %c0_6 = arith.constant 0 : index
    %c0_7 = arith.constant 0 : index
    %7 = vector.load %arg3[%c0_6, %c0_7] : memref<1x128xf32, #tpu.memory_space<vmem>>, vector<1x128xf32>
    %8 = vector.broadcast %7 : vector<1x128xf32> to vector<64x128xf32>
    %9 = arith.addf %6, %8 : vector<64x128xf32>
    %cst_8 = arith.constant 0.000000e+00 : f32
    %10 = vector.broadcast %cst_8 : f32 to vector<64x128xf32>
    %11 = arith.maximumf %9, %10 : vector<64x128xf32>
    %12 = vector.shape_cast %11 : vector<64x128xf32> to vector<1x8x8x128xf32>
    %c0_9 = arith.constant 0 : index
    %c1 = arith.constant 1 : index
    %c1_10 = arith.constant 1 : index
    %c0_11 = arith.constant 0 : index
    %13 = vector.load %arg9[%c0_9, %c1, %c1_10, %c0_11] : memref<1x10x10x128xf32, #tpu.memory_space<vmem>>, vector<1x8x8x128xf32>
    tpu.vector_store %arg9[%c0_9, %c1, %c1_10, %c0_11], %12 {strides = array<i32>} : memref<1x10x10x128xf32, #tpu.memory_space<vmem>>, vector<1x8x8x128xf32>,
    %c0_12 = arith.constant 0 : index
    %c0_13 = arith.constant 0 : index
    %c0_14 = arith.constant 0 : index
    %c0_15 = arith.constant 0 : index
    %14 = vector.load %arg9[%c0_12, %c0_13, %c0_14, %c0_15] : memref<1x10x10x128xf32, #tpu.memory_space<vmem>>, vector<1x8x8x128xf32>
    %c0_16 = arith.constant 0 : index
    %c0_17 = arith.constant 0 : index
    %c0_18 = arith.constant 0 : index
    %c0_19 = arith.constant 0 : index
    %15 = vector.load %arg10[%c0_16, %c0_17, %c0_18, %c0_19] : memref<1x8x8x1152xf32, #tpu.memory_space<vmem>>, vector<1x8x8x128xf32>
    tpu.vector_store %arg10[%c0_16, %c0_17, %c0_18, %c0_19], %14 {strides = array<i32>} : memref<1x8x8x1152xf32, #tpu.memory_space<vmem>>, vector<1x8x8x128xf32>,
    %c0_20 = arith.constant 0 : index
    %c0_21 = arith.constant 0 : index
    %c1_22 = arith.constant 1 : index
    %c0_23 = arith.constant 0 : index
    %16 = vector.load %arg9[%c0_20, %c0_21, %c1_22, %c0_23] : memref<1x10x10x128xf32, #tpu.memory_space<vmem>>, vector<1x8x8x128xf32>
    %c0_24 = arith.constant 0 : index
    %c0_25 = arith.constant 0 : index
    %c0_26 = arith.constant 0 : index
    %c128 = arith.constant 128 : index
    %17 = vector.load %arg10[%c0_24, %c0_25, %c0_26, %c128] : memref<1x8x8x1152xf32, #tpu.memory_space<vmem>>, vector<1x8x8x128xf32>
    tpu.vector_store %arg10[%c0_24, %c0_25, %c0_26, %c128], %16 {strides = array<i32>} : memref<1x8x8x1152xf32, #tpu.memory_space<vmem>>, vector<1x8x8x128xf32>,
    %c0_27 = arith.constant 0 : index
    %c0_28 = arith.constant 0 : index
    %c2 = arith.constant 2 : index
    %c0_29 = arith.constant 0 : index
    %18 = vector.load %arg9[%c0_27, %c0_28, %c2, %c0_29] : memref<1x10x10x128xf32, #tpu.memory_space<vmem>>, vector<1x8x8x128xf32>
    %c0_30 = arith.constant 0 : index
    %c0_31 = arith.constant 0 : index
    %c0_32 = arith.constant 0 : index
    %c256 = arith.constant 256 : index
    %19 = vector.load %arg10[%c0_30, %c0_31, %c0_32, %c256] : memref<1x8x8x1152xf32, #tpu.memory_space<vmem>>, vector<1x8x8x128xf32>
    tpu.vector_store %arg10[%c0_30, %c0_31, %c0_32, %c256], %18 {strides = array<i32>} : memref<1x8x8x1152xf32, #tpu.memory_space<vmem>>, vector<1x8x8x128xf32>,
    %c0_33 = arith.constant 0 : index
    %c1_34 = arith.constant 1 : index
    %c0_35 = arith.constant 0 : index
    %c0_36 = arith.constant 0 : index
    %20 = vector.load %arg9[%c0_33, %c1_34, %c0_35, %c0_36] : memref<1x10x10x128xf32, #tpu.memory_space<vmem>>, vector<1x8x8x128xf32>
    %c0_37 = arith.constant 0 : index
    %c0_38 = arith.constant 0 : index
    %c0_39 = arith.constant 0 : index
    %c384 = arith.constant 384 : index
    %21 = vector.load %arg10[%c0_37, %c0_38, %c0_39, %c384] : memref<1x8x8x1152xf32, #tpu.memory_space<vmem>>, vector<1x8x8x128xf32>
    tpu.vector_store %arg10[%c0_37, %c0_38, %c0_39, %c384], %20 {strides = array<i32>} : memref<1x8x8x1152xf32, #tpu.memory_space<vmem>>, vector<1x8x8x128xf32>,
    %c0_40 = arith.constant 0 : index
    %c1_41 = arith.constant 1 : index
    %c1_42 = arith.constant 1 : index
    %c0_43 = arith.constant 0 : index
    %22 = vector.load %arg9[%c0_40, %c1_41, %c1_42, %c0_43] : memref<1x10x10x128xf32, #tpu.memory_space<vmem>>, vector<1x8x8x128xf32>
    %c0_44 = arith.constant 0 : index
    %c0_45 = arith.constant 0 : index
    %c0_46 = arith.constant 0 : index
    %c512 = arith.constant 512 : index
    %23 = vector.load %arg10[%c0_44, %c0_45, %c0_46, %c512] : memref<1x8x8x1152xf32, #tpu.memory_space<vmem>>, vector<1x8x8x128xf32>
    tpu.vector_store %arg10[%c0_44, %c0_45, %c0_46, %c512], %22 {strides = array<i32>} : memref<1x8x8x1152xf32, #tpu.memory_space<vmem>>, vector<1x8x8x128xf32>,
    %c0_47 = arith.constant 0 : index
    %c1_48 = arith.constant 1 : index
    %c2_49 = arith.constant 2 : index
    %c0_50 = arith.constant 0 : index
    %24 = vector.load %arg9[%c0_47, %c1_48, %c2_49, %c0_50] : memref<1x10x10x128xf32, #tpu.memory_space<vmem>>, vector<1x8x8x128xf32>
    %c0_51 = arith.constant 0 : index
    %c0_52 = arith.constant 0 : index
    %c0_53 = arith.constant 0 : index
    %c640 = arith.constant 640 : index
    %25 = vector.load %arg10[%c0_51, %c0_52, %c0_53, %c640] : memref<1x8x8x1152xf32, #tpu.memory_space<vmem>>, vector<1x8x8x128xf32>
    tpu.vector_store %arg10[%c0_51, %c0_52, %c0_53, %c640], %24 {strides = array<i32>} : memref<1x8x8x1152xf32, #tpu.memory_space<vmem>>, vector<1x8x8x128xf32>,
    %c0_54 = arith.constant 0 : index
    %c2_55 = arith.constant 2 : index
    %c0_56 = arith.constant 0 : index
    %c0_57 = arith.constant 0 : index
    %26 = vector.load %arg9[%c0_54, %c2_55, %c0_56, %c0_57] : memref<1x10x10x128xf32, #tpu.memory_space<vmem>>, vector<1x8x8x128xf32>
    %c0_58 = arith.constant 0 : index
    %c0_59 = arith.constant 0 : index
    %c0_60 = arith.constant 0 : index
    %c768 = arith.constant 768 : index
    %27 = vector.load %arg10[%c0_58, %c0_59, %c0_60, %c768] : memref<1x8x8x1152xf32, #tpu.memory_space<vmem>>, vector<1x8x8x128xf32>
    tpu.vector_store %arg10[%c0_58, %c0_59, %c0_60, %c768], %26 {strides = array<i32>} : memref<1x8x8x1152xf32, #tpu.memory_space<vmem>>, vector<1x8x8x128xf32>,
    %c0_61 = arith.constant 0 : index
    %c2_62 = arith.constant 2 : index
    %c1_63 = arith.constant 1 : index
    %c0_64 = arith.constant 0 : index
    %28 = vector.load %arg9[%c0_61, %c2_62, %c1_63, %c0_64] : memref<1x10x10x128xf32, #tpu.memory_space<vmem>>, vector<1x8x8x128xf32>
    %c0_65 = arith.constant 0 : index
    %c0_66 = arith.constant 0 : index
    %c0_67 = arith.constant 0 : index
    %c896 = arith.constant 896 : index
    %29 = vector.load %arg10[%c0_65, %c0_66, %c0_67, %c896] : memref<1x8x8x1152xf32, #tpu.memory_space<vmem>>, vector<1x8x8x128xf32>
    tpu.vector_store %arg10[%c0_65, %c0_66, %c0_67, %c896], %28 {strides = array<i32>} : memref<1x8x8x1152xf32, #tpu.memory_space<vmem>>, vector<1x8x8x128xf32>,
    %c0_68 = arith.constant 0 : index
    %c2_69 = arith.constant 2 : index
    %c2_70 = arith.constant 2 : index
    %c0_71 = arith.constant 0 : index
    %30 = vector.load %arg9[%c0_68, %c2_69, %c2_70, %c0_71] : memref<1x10x10x128xf32, #tpu.memory_space<vmem>>, vector<1x8x8x128xf32>
    %c0_72 = arith.constant 0 : index
    %c0_73 = arith.constant 0 : index
    %c0_74 = arith.constant 0 : index
    %c1024 = arith.constant 1024 : index
    %31 = vector.load %arg10[%c0_72, %c0_73, %c0_74, %c1024] : memref<1x8x8x1152xf32, #tpu.memory_space<vmem>>, vector<1x8x8x128xf32>
    tpu.vector_store %arg10[%c0_72, %c0_73, %c0_74, %c1024], %30 {strides = array<i32>} : memref<1x8x8x1152xf32, #tpu.memory_space<vmem>>, vector<1x8x8x128xf32>,
    %c0_75 = arith.constant 0 : index
    %c0_76 = arith.constant 0 : index
    %c0_77 = arith.constant 0 : index
    %c0_78 = arith.constant 0 : index
    %32 = vector.load %arg10[%c0_75, %c0_76, %c0_77, %c0_78] : memref<1x8x8x1152xf32, #tpu.memory_space<vmem>>, vector<1x8x8x1152xf32>
    %33 = vector.shape_cast %32 : vector<1x8x8x1152xf32> to vector<64x1152xf32>
    %c0_79 = arith.constant 0 : index
    %c0_80 = arith.constant 0 : index
    %34 = vector.load %arg4[%c0_79, %c0_80] : memref<1152x128xf32, #tpu.memory_space<vmem>>, vector<1152x128xf32>
    %cst_81 = arith.constant dense<0.000000e+00> : vector<64x128xf32>
    %35 = tpu.matmul %33, %34, %cst_81 {dimension_numbers = #tpu.dot_dimension_numbers<[1], [0], [0], [1], [0, 0, 1, 1], [], []>} : vector<64x1152xf32>, vector<1152x128xf32>, vector<64x128xf32> -> vector<64x128xf32>
    %c0_82 = arith.constant 0 : index
    %c0_83 = arith.constant 0 : index
    %36 = vector.load %arg5[%c0_82, %c0_83] : memref<1x128xf32, #tpu.memory_space<vmem>>, vector<1x128xf32>
    %37 = vector.broadcast %36 : vector<1x128xf32> to vector<64x128xf32>
    %38 = arith.addf %35, %37 : vector<64x128xf32>
    %cst_84 = arith.constant 0.000000e+00 : f32
    %39 = vector.broadcast %cst_84 : f32 to vector<64x128xf32>
    %40 = arith.maximumf %38, %39 : vector<64x128xf32>
    %c0_85 = arith.constant 0 : index
    %c0_86 = arith.constant 0 : index
    %41 = vector.load %arg6[%c0_85, %c0_86] : memref<128x128xf32, #tpu.memory_space<vmem>>, vector<128x128xf32>
    %cst_87 = arith.constant dense<0.000000e+00> : vector<64x128xf32>
    %42 = tpu.matmul %40, %41, %cst_87 {dimension_numbers = #tpu.dot_dimension_numbers<[1], [0], [0], [1], [0, 0, 1, 1], [], []>} : vector<64x128xf32>, vector<128x128xf32>, vector<64x128xf32> -> vector<64x128xf32>
    %c0_88 = arith.constant 0 : index
    %c0_89 = arith.constant 0 : index
    %43 = vector.load %arg7[%c0_88, %c0_89] : memref<1x128xf32, #tpu.memory_space<vmem>>, vector<1x128xf32>
    %44 = vector.broadcast %43 : vector<1x128xf32> to vector<64x128xf32>
    %45 = arith.addf %42, %44 : vector<64x128xf32>
    %c0_90 = arith.constant 0 : index
    %c0_91 = arith.constant 0 : index
    %c0_92 = arith.constant 0 : index
    %c0_93 = arith.constant 0 : index
    %46 = vector.load %arg1[%c0_90, %c0_91, %c0_92, %c0_93] : memref<1x8x8x128xf32, #tpu.memory_space<vmem>>, vector<1x8x8x128xf32>
    %47 = vector.shape_cast %46 : vector<1x8x8x128xf32> to vector<64x128xf32>
    %48 = arith.addf %45, %47 : vector<64x128xf32>
    %cst_94 = arith.constant 0.000000e+00 : f32
    %49 = vector.broadcast %cst_94 : f32 to vector<64x128xf32>
    %50 = arith.maximumf %48, %49 : vector<64x128xf32>
    %51 = vector.shape_cast %50 : vector<64x128xf32> to vector<1x8x8x128xf32>
    %c0_95 = arith.constant 0 : index
    %c0_96 = arith.constant 0 : index
    %c0_97 = arith.constant 0 : index
    %c0_98 = arith.constant 0 : index
    %52 = vector.load %arg8[%c0_95, %c0_96, %c0_97, %c0_98] : memref<1x8x8x128xf32, #tpu.memory_space<vmem>>, vector<1x8x8x128xf32>
    tpu.vector_store %arg8[%c0_95, %c0_96, %c0_97, %c0_98], %51 {strides = array<i32>} : memref<1x8x8x128xf32, #tpu.memory_space<vmem>>, vector<1x8x8x128xf32>,
    return
  }
  func.func @transform_0(%arg0: i32) -> (i32, i32, i32, i32) {
    %c0_i32 = arith.constant 0 : i32
    %c0_i32_0 = arith.constant 0 : i32
    %c0_i32_1 = arith.constant 0 : i32
    %c0_i32_2 = arith.constant 0 : i32
    return %arg0, %c0_i32, %c0_i32_0, %c0_i32_1 : i32, i32, i32, i32
  }
  func.func @transform_1(%arg0: i32) -> (i32, i32) {
    %c0_i32 = arith.constant 0 : i32
    %c0_i32_0 = arith.constant 0 : i32
    %c0_i32_1 = arith.constant 0 : i32
    return %c0_i32, %c0_i32_0 : i32, i32
  }
  func.func @transform_2(%arg0: i32) -> (i32, i32) {
    %c0_i32 = arith.constant 0 : i32
    %c0_i32_0 = arith.constant 0 : i32
    %c0_i32_1 = arith.constant 0 : i32
    return %c0_i32, %c0_i32_0 : i32, i32
  }
  func.func @transform_3(%arg0: i32) -> (i32, i32) {
    %c0_i32 = arith.constant 0 : i32
    %c0_i32_0 = arith.constant 0 : i32
    %c0_i32_1 = arith.constant 0 : i32
    return %c0_i32, %c0_i32_0 : i32, i32
  }
  func.func @transform_4(%arg0: i32) -> (i32, i32) {
    %c0_i32 = arith.constant 0 : i32
    %c0_i32_0 = arith.constant 0 : i32
    %c0_i32_1 = arith.constant 0 : i32
    return %c0_i32, %c0_i32_0 : i32, i32
  }
  func.func @transform_5(%arg0: i32) -> (i32, i32) {
    %c0_i32 = arith.constant 0 : i32
    %c0_i32_0 = arith.constant 0 : i32
    %c0_i32_1 = arith.constant 0 : i32
    return %c0_i32, %c0_i32_0 : i32, i32
  }
  func.func @transform_6(%arg0: i32) -> (i32, i32) {
    %c0_i32 = arith.constant 0 : i32
    %c0_i32_0 = arith.constant 0 : i32
    %c0_i32_1 = arith.constant 0 : i32
    return %c0_i32, %c0_i32_0 : i32, i32
  }
  func.func @transform_7(%arg0: i32) -> (i32, i32, i32, i32) {
    %c0_i32 = arith.constant 0 : i32
    %c0_i32_0 = arith.constant 0 : i32
    %c0_i32_1 = arith.constant 0 : i32
    %c0_i32_2 = arith.constant 0 : i32
    return %arg0, %c0_i32, %c0_i32_0, %c0_i32_1 : i32, i32, i32, i32
  }
}

</mosaic_0001>

<bundles_post_ra>
// kernel: tpu_custom_call.1
= control target key start
LH: loop header
LB: loop body
LE: loop exit
PB: predicated region body
PF: predicated region fallthrough
CT: control target
= control target key end

     0   :  { %12 = vsyncpa [#allocation5], 0  ;;  %s3144_s0 = inlined_call_operand.hbm [shape: f32[2,8,8,128], index: 0, kind: input, shape index: {}]   ;;  %s3145_s1 = inlined_call_operand.hbm [shape: f32[128,128], index: 1, kind: input, shape index: {}]   ;;  %s3146_s2 = inlined_call_operand.vmem [shape: f32[1,128], index: 2, kind: input, shape index: {}]   ;;  %s3147_s3 = inlined_call_operand.hbm [shape: f32[1152,128], index: 3, kind: input, shape index: {}]   ;;  %s3148_s4 = inlined_call_operand.vmem [shape: f32[1,128], index: 4, kind: input, shape index: {}]   ;;  %s3149_s5 = inlined_call_operand.hbm [shape: f32[128,128], index: 5, kind: input, shape index: {}]   ;;  %s3150_s6 = inlined_call_operand.vmem [shape: f32[1,128], index: 6, kind: input, shape index: {}]   ;;  %s3151_s7 = inlined_call_operand.hbm [shape: f32[2,8,8,128], index: 7, kind: output, shape index: {}]  }
   0x1   :  { %14 = vsyncpa [#allocation5 + $0x1], 0 }
   0x2   :  { %15 = vsyncpa [#allocation8], 0 }
   0x3   :  { %16 = vsyncpa [#allocation11], 0 }
   0x4   :  { %17 = vsyncpa [#allocation6], 0 }
   0x5   :  { %19 = vsyncpa [#allocation6 + $0x1], 0  ;;  %s2711_s24 = smov 0   ;;  %s2713_s25 = smov 0  }
   0x6   :  { %s2715_s26 = smov 0   ;;  %s2717_s27 = smov 0  }
   0x7 LB: > { %s2732_s28 = sadd.s32 4294967295, %s2659_s27   ;;  %s1695_s29 = sadd.s32 4294967294, %s2659_s27   ;;  %s2659_s27 = sphi %s2717_s27, %s3178_s27   ;;  %s2655_s26 = sphi %s2715_s26, %s3177_s26   ;;  %s2651_s25 = sphi %s2713_s25, %s3176_s25   ;;  %s2647_s24 = sphi %s2711_s24, %s3175_s24  }
   0x8   : > { %p45_p0 = scmp.ne.s32.totalorder %s2651_s25, %s2647_s24  ;;  %p3152_p1 = scmp.eq.s32.totalorder %s2732_s28, 0 }
   0x9   : > { %p201_p3 = scmp.eq.s32.totalorder %s1695_s29, 1  ;;  %p1696_p5 = scmp.ge.s32.totalorder %s2659_s27, 1 }
   0xa   : > { %p2741_p4 = por %p3152_p1, %p45_p0  ;;  %p208_p7 = scmp.lt.s32.totalorder %s2659_s27, 3 }
   0xb   : > { %p2746_p6 = por %p201_p3, %p45_p0  ;;  %s2661_s10 = smov [#allocation7]  }
   0xc   : > { %s3156_s30 = scalar_select %p2741_p4, 1, 0 }
   0xd   : > { %s3157_s8 = scalar_select %p2746_p6, 1, 0 }
   0xe   : > { %p2752_p9 = pnand %p1696_p5, %p208_p7  ;;  %s220_s11 = sshll.u32 %s2661_s10, 4  ;;  %s2756_s11 = int_to_ptr.vmem [resolvable:$true] %s220_s11 }
   0xf   : > { %3158 = sst [smem:[#allocation17_spill]] %s3157_s8  ;;  %s2662_s13 = smov [#allocation9]  }
  0x10   : > { %s3159_s9 = scalar_select %p2752_p9, 1, 0 }
  0x11   : > { %p2405_p10 = pneg %p2752_p9  ;;  %s236_s14 = sshll.u32 %s2662_s13, 4  ;;  %s2767_s14 = int_to_ptr.vmem [resolvable:$true] %s236_s14 }
  0x12   : > { %s2663_s15 = smov [#allocation10]   ;;  %s2471_s19 = scalar_lea.hbm %s3145_s1, 2048 }
  0x13   : > { %p2763_p12 = pnand %p2405_p10, %p3152_p1  ;;  %s2769_s16 = sshll.u32 %s2663_s15, 4  ;;  %s253_s16 = int_to_ptr.vmem [resolvable:$true] %s2769_s16 }
  0x14   : > { %p2472_p13 = scmp.ne.s32.totalorder %s3145_s1, %s2471_s19  ;;  %p2478_p7 = scmp.lt.u32.totalorder %s2471_s19, %s3145_s1 }
  0x15   : > { %p2779_p0 = pneg %p2763_p12 }
  0x17   : > { %p2474_p3 = pnand %p2779_p0, %p2472_p13 }
  0x19   : > { %p2475_p5 = pneg %p2474_p3 }
  0x1b   : > { %p2480_p10 = pnand %p2478_p7, %p2475_p5 }
  0x1d   : > { %2483 = shalt.err (!%p2480_p10)
}
  0x1e   : > { %s2484_s10 = scalar_lea.vmem %s2756_s11, 2048  ;;  %p2492_p2 = scmp.lt.s32.totalorder %s2756_s11, %s2756_s11 }
  0x1f   : > { %p2485_p11 = scmp.ne.s32.totalorder %s2756_s11, %s2484_s10  ;;  %p2493_p6 = scmp.lt.s32.totalorder %s2484_s10, %s2484_s10 }
  0x21   : > { %p2487_p8 = pnand %p2485_p11, %p2779_p0  ;;  %p2494_p13 = por %p2493_p6, %p2492_p2 }
  0x23   : > { %p2488_p1 = pneg %p2487_p8 }
  0x25   : > { %p2495_p3 = pnand %p2494_p13, %p2488_p1 }
  0x27   : > { %2498 = shalt.err (!%p2495_p3)
}
  0x28   : > { %s2664_s13 = smov 128   ;;  %s2665_s15 = smov 8  }
  0x29   : > { %2408 = dma.hbm_to_vmem [thread:$0]  (!%p2763_p12), %s3145_s1, 2048, %s2756_s11, [#allocation8], %s2664_s13, %s2664_s13, %s2665_s15  }
  0x2a   : > { %s2499_s21 = scalar_lea.hbm %s3147_s3, 18432 }
  0x2b   : > { %p2500_p1 = scmp.ne.s32.totalorder %s3147_s3, %s2499_s21  ;;  %p2506_p8 = scmp.lt.u32.totalorder %s2499_s21, %s3147_s3 }
  0x2d   : > { %p2502_p2 = pnand %p2500_p1, %p2779_p0 }
  0x2f   : > { %p2503_p6 = pneg %p2502_p2 }
  0x31   : > { %p2508_p11 = pnand %p2506_p8, %p2503_p6 }
  0x33   : > { %2511 = shalt.err (!%p2508_p11)
}
  0x34   : > { %s2512_s11 = scalar_lea.vmem %s2767_s14, 18432  ;;  %p2520_p13 = scmp.lt.s32.totalorder %s2767_s14, %s2767_s14 }
  0x35   : > { %p2513_p5 = scmp.ne.s32.totalorder %s2767_s14, %s2512_s11  ;;  %p2521_p3 = scmp.lt.s32.totalorder %s2512_s11, %s2512_s11 }
  0x37   : > { %p2515_p7 = pnand %p2513_p5, %p2779_p0  ;;  %p2522_p1 = por %p2521_p3, %p2520_p13 }
  0x39   : > { %p2516_p10 = pneg %p2515_p7 }
  0x3b   : > { %p2523_p2 = pnand %p2522_p1, %p2516_p10 }
  0x3d   : > { %2526 = shalt.err (!%p2523_p2)
}
  0x3e   : > { %2411 = dma.hbm_to_vmem [thread:$0]  (!%p2763_p12), %s3147_s3, 18432, %s2767_s14, [#allocation8], %s2664_s13, %s2664_s13, %s2665_s15  }
  0x3f   : > { %s2527_s20 = scalar_lea.hbm %s3149_s5, 2048 }
  0x40   : > { %p2528_p6 = scmp.ne.s32.totalorder %s3149_s5, %s2527_s20  ;;  %p2534_p5 = scmp.lt.u32.totalorder %s2527_s20, %s3149_s5 }
  0x42   : > { %p2530_p8 = pnand %p2528_p6, %p2779_p0 }
  0x44   : > { %p2531_p11 = pneg %p2530_p8 }
  0x46   : > { %p2536_p7 = pnand %p2534_p5, %p2531_p11 }
  0x48   : > { %2539 = shalt.err (!%p2536_p7)
}
  0x49   : > { %s2540_s11 = scalar_lea.vmem %s253_s16, 2048  ;;  %p2548_p1 = scmp.lt.s32.totalorder %s253_s16, %s253_s16 }
  0x4a   : > { %p2541_p10 = scmp.ne.s32.totalorder %s253_s16, %s2540_s11  ;;  %p2549_p2 = scmp.lt.s32.totalorder %s2540_s11, %s2540_s11 }
  0x4c   : > { %p2543_p13 = pnand %p2541_p10, %p2779_p0  ;;  %p2550_p4 = por %p2549_p2, %p2548_p1 }
  0x4e   : > { %p2544_p3 = pneg %p2543_p13 }
  0x50   : > { %p2551_p9 = pnand %p2550_p4, %p2544_p3 }
  0x52   : > { %2554 = shalt.err (!%p2551_p9)
}
  0x53   : > { %2414 = dma.hbm_to_vmem [thread:$0]  (!%p2763_p12), %s3149_s5, 2048, %s253_s16, [#allocation11], %s2664_s13, %s2664_s13, %s2665_s15  }
  0x54   : > { %s2852_s22 = sadd.s32 1, %s2659_s27   ;;  %s32_s17 = sadd.s32 1, %s2655_s26 }
  0x55   : > { %s29_s12 = ssub.s32 %s2659_s27, %s2852_s22  ;;  %p39_p9 = scmp.ne.s32.totalorder %s2655_s26, %s2651_s25 }
  0x56   : > { %p30_p4 = scmp.eq.s32.totalorder %s29_s12, 0  ;;  %p40_p0 = scmp.eq.s32.totalorder %s2659_s27, 0 }
  0x57   : > { %p2426_p6 = scmp.lt.s32.totalorder %s2659_s27, 2  ;;  %p3162_p11 = scmp.eq.s32.totalorder %s2732_s28, 1 }
  0x58   : > { %s2862_s18 = scalar_select %p30_p4, %s2655_s26, %s32_s17  }
  0x59   : > { %p41_p8 = por %p40_p0, %p39_p9  ;;  %p2866_p5 = por %p3162_p11, %p39_p9 }
  0x5a   : > { %s269_s20 = sand.u32 1, %s2655_s26   ;;  %s1719_s21 = sshll.u32 %s2659_s27, 10 }
  0x5b   : > { %s1701_s16 = sshll.u32 %s269_s20, 6  ;;  %s2875_s10 = scalar_lea.hbm %s3144_s0, %s1719_s21 }
  0x5c   : > { %s273_s11 = scalar_lea.vmem [#allocation4], %s1701_s16  ;;  %p2877_p12 = pnand %p2426_p6, %p41_p8 }
  0x5d   : > { %s280_s14 = sshll.u32 %s273_s11, 4  ;;  %s2883_s12 = scalar_lea.sflag [#allocation5], %s269_s20  ;;  %s2881_s14 = int_to_ptr.vmem [resolvable:$true] %s280_s14 }
  0x5e   : > { %s2555_s17 = scalar_lea.hbm %s2875_s10, 1024  ;;  %p2557_p10 = pneg %p2877_p12 }
  0x5f   : > { %p2556_p7 = scmp.ne.s32.totalorder %s2875_s10, %s2555_s17  ;;  %s2560_s23 = scalar_lea.hbm %s3144_s0, 2048 }
  0x60   : > { %p2561_p1 = scmp.lt.u32.totalorder %s2875_s10, %s3144_s0  ;;  %p2562_p2 = scmp.lt.u32.totalorder %s2560_s23, %s2555_s17 }
  0x61   : > { %p2558_p13 = pnand %p2557_p10, %p2556_p7  ;;  %p2564_p9 = scmp.lt.u32.totalorder %s2555_s17, %s2875_s10 }
  0x62   : > { %p2563_p4 = por %p2562_p2, %p2561_p1 }
  0x63   : > { %p2559_p3 = pneg %p2558_p13 }
  0x64   : > { %p2565_p0 = por %p2564_p9, %p2563_p4 }
  0x66   : > { %p2566_p6 = pnand %p2565_p0, %p2559_p3 }
  0x68   : > { %2569 = shalt.err (!%p2566_p6)
}
  0x69   : > { %s2570_s20 = scalar_lea.vmem %s2881_s14, 1024  ;;  %s2666_s21 = smov [#allocation4]  }
  0x6a   : > { %p2571_p8 = scmp.ne.s32.totalorder %s2881_s14, %s2570_s20  ;;  %s2575_s16 = sshll.u32 %s2666_s21, 4  ;;  %s2576_s16 = int_to_ptr.vmem [resolvable:$false] %s2575_s16 }
  0x6b   : > { %s2577_s29 = scalar_lea.vmem %s2576_s16, 2048  ;;  %p2578_p13 = scmp.lt.s32.totalorder %s2881_s14, %s2576_s16 }
  0x6c   : > { %p2573_p11 = pnand %p2571_p8, %p2557_p10  ;;  %p2579_p1 = scmp.lt.s32.totalorder %s2577_s29, %s2570_s20 }
  0x6e   : > { %p2574_p7 = pneg %p2573_p11  ;;  %p2580_p2 = por %p2579_p1, %p2578_p13 }
  0x70   : > { %p2581_p4 = pnand %p2580_p2, %p2574_p7 }
  0x72   : > { %2584 = shalt.err (!%p2581_p4)
}
  0x73   : > { %2418 = dma.hbm_to_vmem [thread:$0]  (!%p2877_p12), %s2875_s10, 1024, %s2881_s14, %s2883_s12, %s2664_s13, %s2664_s13, %s2665_s15  }
  0x74   : > { %p3165_p10 = scmp.ne.s32.totalorder %s3159_s9, 0 }
  0x75   : > { %s2917_s17 = sand.u32 (!%p3165_p10), 1, %s2651_s25   ;;  %p3166_p3 = scmp.ne.s32.totalorder (!%p3165_p10), %s3156_s30, 0 }
  0x76   : > { %292 = sbr.rel (%p3165_p10) target bundleno = 929 (0x3a1), region = 48  ;;  %s1705_s23 = sshll.u32 (!%p3165_p10), %s2917_s17, 6 }
  0x77   : > { %s295_s11 = scalar_lea.sflag (!%p3165_p10), [#allocation5], %s2917_s17  ;;  %s2921_s20 = scalar_lea.vmem (!%p3165_p10), [#allocation4], %s1705_s23 }
  0x7d   : > { %2630 = dma.done.wait (%p3166_p3), %s295_s11, 1024  }
  0x7e   : > { %2632 = vsyncadd (%p3166_p3), %s295_s11, 4294966272  ;;  %p3167_p12 = scmp.eq.s32.totalorder %s2732_s28, 0 }
  0x80   : > { %2634 = dma.done.wait (%p3167_p12), [#allocation8], 20480   ;;  %p3168_p9 = pmov %p3167_p12 }
  0x82   : > { %2636 = vsyncadd (%p3168_p9), [#allocation8], 4294946816  ;;  %p3169_p0 = pmov %p3168_p9 }
  0x84   : > { %2638 = dma.done.wait (%p3169_p0), [#allocation11], 2048   ;;  %p3170_p6 = pmov %p3169_p0 }
  0x85   : > { %s2935_s9 = scalar_lea.vmem [#allocation12], %s1705_s23  ;;  %p3171_p8 = scmp.ne.s32.totalorder %s2732_s28, 0 }
  0x86   : > { %2640 = vsyncadd (%p3170_p6), [#allocation11], 4294965248  ;;  %v2667_v0 = vmov (!%p3171_p8), 0.0  }
  0x87   : > { %344 = sbr.rel (%p3171_p8) target bundleno = 145 (0x91), region = 68  ;;  %345 = vst [vmem:[#allocation2] sm:$0xff] (!%p3171_p8), %v2667_v0  ;;  %346 = vst [vmem:[#allocation2 + $0x8] sm:$0x3] (!%p3171_p8), %v2667_v0 }
  0x88   : > { %347 = vst [vmem:[#allocation2 + $0x10] sm:$0xff] (!%p3171_p8), %v2667_v0  ;;  %348 = vst [vmem:[#allocation2 + $0x18] sm:$0x3] (!%p3171_p8), %v2667_v0 }
  0x89   : > { %349 = vst [vmem:[#allocation2 + $0x20] sm:$0xff] (!%p3171_p8), %v2667_v0  ;;  %350 = vst [vmem:[#allocation2 + $0x28] sm:$0x3] (!%p3171_p8), %v2667_v0 }
  0x8a   : > { %351 = vst [vmem:[#allocation2 + $0x30] sm:$0xff] (!%p3171_p8), %v2667_v0  ;;  %352 = vst [vmem:[#allocation2 + $0x38] sm:$0x3] (!%p3171_p8), %v2667_v0 }
  0x8b   : > { %353 = vst [vmem:[#allocation2 + $0x40] sm:$0xff] (!%p3171_p8), %v2667_v0  ;;  %354 = vst [vmem:[#allocation2 + $0x48] sm:$0x3] (!%p3171_p8), %v2667_v0 }
  0x8c   : > { %355 = vst [vmem:[#allocation2 + $0x50] sm:$0xff] (!%p3171_p8), %v2667_v0  ;;  %356 = vst [vmem:[#allocation2 + $0x58] sm:$0x3] (!%p3171_p8), %v2667_v0 }
  0x8d   : > { %357 = vst [vmem:[#allocation2 + $0x60] sm:$0xff] (!%p3171_p8), %v2667_v0  ;;  %358 = vst [vmem:[#allocation2 + $0x68] sm:$0x3] (!%p3171_p8), %v2667_v0 }
  0x8e   : > { %359 = vst [vmem:[#allocation2 + $0x70] sm:$0xff] %v2667_v0  ;;  %360 = vst [vmem:[#allocation2 + $0x78] sm:$0x3] %v2667_v0 }
  0x8f   : > { %361 = vst [vmem:[#allocation2 + $0x80] sm:$0xff] %v2667_v0  ;;  %362 = vst [vmem:[#allocation2 + $0x88] sm:$0x3] %v2667_v0 }
  0x90   : > { %363 = vst [vmem:[#allocation2 + $0x90] sm:$0xff] %v2667_v0  ;;  %364 = vst [vmem:[#allocation2 + $0x98] sm:$0x3] %v2667_v0 }
  0x91 PF: > { %v373_v1 = vld [vmem:[#allocation7] sm:$0xff]  ;;  %v374_v2 = vld [vmem:[#allocation7 + $0x8] sm:$0xff]  ;;  %v375_v3 = vld [vmem:[#allocation7 + $0x10] sm:$0xff]  ;;  %s1720_s12 = sshll.u32 %s2732_s28, 10  ;;  %s1593_s21 = sshll.u32 %s2935_s9, 4  ;;  %s3098_s21 = int_to_ptr.vmem [resolvable:$true] %s1593_s21 }
  0x92   : > { %v2149_v4 = vpack.c.bf16 %v374_v2, %v373_v1  ;;  %v376_v5 = vld [vmem:[#allocation7 + $0x18] sm:$0xff]  ;;  %v377_v7 = vld [vmem:[#allocation7 + $0x20] sm:$0xff]  ;;  %v378_v8 = vld [vmem:[#allocation7 + $0x28] sm:$0xff]  ;;  %s3096_s23 = scalar_lea.hbm %s3151_s7, %s1720_s12  ;;  %s1580_s28 = scalar_lea.sflag [#allocation6], %s2917_s17 }
  0x93   : > { %v2153_v6 = vpack.c.bf16 %v376_v5, %v375_v3  ;;  %v2157_v9 = vpack.c.bf16 %v378_v8, %v377_v7  ;;  %v365_v10 = vld [vmem:[%s2921_s20] sm:$0xff]  ;;  %v379_v11 = vld [vmem:[#allocation7 + $0x30] sm:$0xff]  ;;  %v380_v12 = vld [vmem:[#allocation7 + $0x38] sm:$0xff]  ;;  %s2585_s11 = scalar_lea.vmem %s3098_s21, 1024 }
  0x94   : > { %2150 = vmatprep.subr.bf16.mxu0 %v2149_v4  ;;  %2049 = vmatprep.mubr.f32.mxu0 %v365_v10  ;;  %v381_v13 = vld [vmem:[#allocation7 + $0x40] sm:$0xff]  ;;  %v752_v15 = vld [vmem:[#allocation9 + $0x88] sm:$0xff]  ;;  %v2161_v17 = vpack.c.bf16 %v380_v12, %v379_v11  ;;  %v753_v20 = vld [vmem:[#allocation9 + $0x90] sm:$0xff]  ;;  %p2586_p11 = scmp.ne.s32.totalorder %s3098_s21, %s2585_s11 }
  0x95   : > { %2152 = vmatpush3.bf16.msra.mxu0 %v2149_v4  ;;  %v751_v14 = vld [vmem:[#allocation9 + $0x80] sm:$0xff]  ;;  %v736_v19 = vld [vmem:[#allocation9 + $0x8] sm:$0xff]  ;;  %v754_v21 = vld [vmem:[#allocation9 + $0x98] sm:$0xff] }
  0x96   : > { %2154 = vmatprep.subr.bf16.mxu0 %v2153_v6  ;;  %v735_v16 = vld [vmem:[#allocation9] sm:$0xff]  ;;  %v2181_v18 = vpack.c.bf16 %v752_v15, %v751_v14  ;;  %v382_v22 = vld [vmem:[#allocation7 + $0x48] sm:$0xff]  ;;  %v2185_v24 = vpack.c.bf16 %v754_v21, %v753_v20  ;;  %v737_v25 = vld [vmem:[#allocation9 + $0x10] sm:$0xff]  ;;  %p2587_p7 = pnand %p2586_p11, %p2866_p5 }
  0x97   : > { %v2183_v23 = vpack.c.bf16 %v736_v19, %v735_v16  ;;  %v738_v26 = vld [vmem:[#allocation9 + $0x18] sm:$0xff]  ;;  %v755_v28 = vld [vmem:[#allocation9 + $0xa0] sm:$0xff]  ;;  %v756_v29 = vld [vmem:[#allocation9 + $0xa8] sm:$0xff]  ;;  %v2165_v30 = vpack.c.bf16 %v382_v22, %v381_v13 }
  0x98   : > { %2182 = vmatprep.subr.bf16.mxu1 %v2181_v18  ;;  %v2187_v27 = vpack.c.bf16 %v738_v26, %v737_v25  ;;  %v2189_v31 = vpack.c.bf16 %v756_v29, %v755_v28  ;;  %v739_v32 = vld [vmem:[#allocation9 + $0x20] sm:$0xff]  ;;  %v740_v33 = vld [vmem:[#allocation9 + $0x28] sm:$0xff]  ;;  %v383_v34 = vld [vmem:[#allocation7 + $0x50] sm:$0xff]  ;;  %p2588_p13 = pneg %p2587_p7 }
  0x99   : > { %2156 = vmatpush3.bf16.msra.mxu0 %v2153_v6  ;;  %2184 = vmatpush3.bf16.msra.mxu1 %v2183_v23  ;;  %v384_v35 = vld [vmem:[#allocation7 + $0x58] sm:$0xff]  ;;  %v757_v36 = vld [vmem:[#allocation9 + $0xb0] sm:$0xff]  ;;  %v2191_v38 = vpack.c.bf16 %v740_v33, %v739_v32  ;;  %v385_v40 = vld [vmem:[#allocation7 + $0x60] sm:$0xff] }
  0x9a   : > { %2158 = vmatprep.subr.bf16.mxu0 %v2157_v9  ;;  %2186 = vmatprep.subr.bf16.mxu1 %v2185_v24  ;;  %v758_v37 = vld [vmem:[#allocation9 + $0xb8] sm:$0xff]  ;;  %v2169_v39 = vpack.c.bf16 %v384_v35, %v383_v34  ;;  %v741_v42 = vld [vmem:[#allocation9 + $0x30] sm:$0xff]  ;;  %v386_v44 = vld [vmem:[#allocation7 + $0x68] sm:$0xff] }
  0x9b   : > { %v2193_v41 = vpack.c.bf16 %v758_v37, %v757_v36  ;;  %v742_v43 = vld [vmem:[#allocation9 + $0x38] sm:$0xff]  ;;  %v759_v45 = vld [vmem:[#allocation9 + $0xc0] sm:$0xff]  ;;  %v760_v46 = vld [vmem:[#allocation9 + $0xc8] sm:$0xff]  ;;  %v2173_v48 = vpack.c.bf16 %v386_v44, %v385_v40 }
  0x9c   : > { %v2195_v47 = vpack.c.bf16 %v742_v43, %v741_v42  ;;  %v387_v49 = vld [vmem:[#allocation7 + $0x70] sm:$0xff]  ;;  %v2197_v50 = vpack.c.bf16 %v760_v46, %v759_v45  ;;  %v743_v51 = vld [vmem:[#allocation9 + $0x40] sm:$0xff]  ;;  %v744_v52 = vld [vmem:[#allocation9 + $0x48] sm:$0xff] }
  0x9d   : > { %2160 = vmatpush3.bf16.msra.mxu0 %v2157_v9  ;;  %2188 = vmatpush3.bf16.msra.mxu1 %v2187_v27  ;;  %v388_v53 = vld [vmem:[#allocation7 + $0x78] sm:$0xff]  ;;  %v761_v54 = vld [vmem:[#allocation9 + $0xd0] sm:$0xff]  ;;  %v2199_v56 = vpack.c.bf16 %v744_v52, %v743_v51  ;;  %v783_v61 = vld [vmem:[#allocation9 + $0x180] sm:$0xff] }
  0x9e   : > { %2162 = vmatprep.subr.bf16.mxu0 %v2161_v17  ;;  %2190 = vmatprep.subr.bf16.mxu1 %v2189_v31  ;;  %v762_v55 = vld [vmem:[#allocation9 + $0xd8] sm:$0xff]  ;;  %v2177_v57 = vpack.c.bf16 %v388_v53, %v387_v49  ;;  %v745_v59 = vld [vmem:[#allocation9 + $0x50] sm:$0xff]  ;;  %v784_v62 = vld [vmem:[#allocation9 + $0x188] sm:$0xff] }
  0x9f   : > { %v2201_v58 = vpack.c.bf16 %v762_v55, %v761_v54  ;;  %v746_v60 = vld [vmem:[#allocation9 + $0x58] sm:$0xff]  ;;  %v2213_v0 = vpack.c.bf16 %v784_v62, %v783_v61  ;;  %v767_v1 = vld [vmem:[#allocation9 + $0x100] sm:$0xff]  ;;  %v768_v2 = vld [vmem:[#allocation9 + $0x108] sm:$0xff] }
  0xa0   : > { %v2203_v63 = vpack.c.bf16 %v746_v60, %v745_v59  ;;  %v785_v3 = vld [vmem:[#allocation9 + $0x190] sm:$0xff]  ;;  %v786_v4 = vld [vmem:[#allocation9 + $0x198] sm:$0xff]  ;;  %v366_v5 = vld [vmem:[%s2921_s20 + $0x8] sm:$0xff]  ;;  %v2215_v6 = vpack.c.bf16 %v768_v2, %v767_v1 }
  0xa1   : > { %2164 = vmatpush3.bf16.msra.mxu0 %v2161_v17  ;;  %2192 = vmatpush3.bf16.msra.mxu1 %v2191_v38  ;;  %v367_v7 = vld [vmem:[%s2921_s20 + $0x10] sm:$0xff]  ;;  %v2217_v8 = vpack.c.bf16 %v786_v4, %v785_v3  ;;  %v770_v10 = vld [vmem:[#allocation9 + $0x118] sm:$0xff]  ;;  %v787_v11 = vld [vmem:[#allocation9 + $0x1a0] sm:$0xff] }
  0xa2   : > { %2166 = vmatprep.subr.bf16.mxu0 %v2165_v30  ;;  %2194 = vmatprep.subr.bf16.mxu1 %v2193_v41  ;;  %v769_v9 = vld [vmem:[#allocation9 + $0x110] sm:$0xff]  ;;  %v788_v12 = vld [vmem:[#allocation9 + $0x1a8] sm:$0xff]  ;;  %v368_v13 = vld [vmem:[%s2921_s20 + $0x18] sm:$0xff] }
  0xa3   : > { %v2219_v14 = vpack.c.bf16 %v770_v10, %v769_v9  ;;  %v369_v15 = vld [vmem:[%s2921_s20 + $0x20] sm:$0xff]  ;;  %v2221_v16 = vpack.c.bf16 %v788_v12, %v787_v11  ;;  %v772_v18 = vld [vmem:[#allocation9 + $0x128] sm:$0xff]  ;;  %v789_v19 = vld [vmem:[#allocation9 + $0x1b0] sm:$0xff] }
  0xa4   : > { %v771_v17 = vld [vmem:[#allocation9 + $0x120] sm:$0xff]  ;;  %v790_v20 = vld [vmem:[#allocation9 + $0x1b8] sm:$0xff]  ;;  %v370_v21 = vld [vmem:[%s2921_s20 + $0x28] sm:$0xff] }
  0xa5   : > { %2168 = vmatpush3.bf16.msra.mxu0 %v2165_v30  ;;  %2196 = vmatpush3.bf16.msra.mxu1 %v2195_v47  ;;  %v2223_v22 = vpack.c.bf16 %v772_v18, %v771_v17  ;;  %v371_v23 = vld [vmem:[%s2921_s20 + $0x30] sm:$0xff]  ;;  %v2225_v24 = vpack.c.bf16 %v790_v20, %v789_v19  ;;  %v774_v26 = vld [vmem:[#allocation9 + $0x138] sm:$0xff]  ;;  %v791_v27 = vld [vmem:[#allocation9 + $0x1c0] sm:$0xff] }
  0xa6   : > { %2170 = vmatprep.subr.bf16.mxu0 %v2169_v39  ;;  %2198 = vmatprep.subr.bf16.mxu1 %v2197_v50  ;;  %v773_v25 = vld [vmem:[#allocation9 + $0x130] sm:$0xff]  ;;  %v792_v28 = vld [vmem:[#allocation9 + $0x1c8] sm:$0xff]  ;;  %v372_v29 = vld [vmem:[%s2921_s20 + $0x38] sm:$0xff] }
  0xa7   : > { %v2227_v30 = vpack.c.bf16 %v774_v26, %v773_v25  ;;  %v2229_v31 = vpack.c.bf16 %v792_v28, %v791_v27  ;;  %v763_v32 = vld [vmem:[#allocation9 + $0xe0] sm:$0xff]  ;;  %v764_v33 = vld [vmem:[#allocation9 + $0xe8] sm:$0xff]  ;;  %v765_v41 = vld [vmem:[#allocation9 + $0xf0] sm:$0xff] }
  0xa8   : > { %v2205_v34 = vpack.c.bf16 %v764_v33, %v763_v32  ;;  %v747_v35 = vld [vmem:[#allocation9 + $0x60] sm:$0xff]  ;;  %v748_v36 = vld [vmem:[#allocation9 + $0x68] sm:$0xff]  ;;  %v766_v42 = vld [vmem:[#allocation9 + $0xf8] sm:$0xff] }
  0xa9   : > { %2172 = vmatpush3.bf16.msra.mxu0 %v2169_v39  ;;  %2200 = vmatpush3.bf16.msra.mxu1 %v2199_v56  ;;  %v2207_v37 = vpack.c.bf16 %v748_v36, %v747_v35  ;;  %v775_v38 = vld [vmem:[#allocation9 + $0x140] sm:$0xff]  ;;  %v776_v39 = vld [vmem:[#allocation9 + $0x148] sm:$0xff]  ;;  %v2209_v43 = vpack.c.bf16 %v766_v42, %v765_v41  ;;  %v749_v44 = vld [vmem:[#allocation9 + $0x70] sm:$0xff] }
  0xaa   : > { %2174 = vmatprep.subr.bf16.mxu0 %v2173_v48  ;;  %2202 = vmatprep.subr.bf16.mxu1 %v2201_v58  ;;  %v2231_v40 = vpack.c.bf16 %v776_v39, %v775_v38  ;;  %v750_v45 = vld [vmem:[#allocation9 + $0x78] sm:$0xff]  ;;  %v793_v46 = vld [vmem:[#allocation9 + $0x1d0] sm:$0xff]  ;;  %v534_v53 = vld [vmem:[#allocation2 + $0x1] sm:$0xff] }
  0xab   : > { %v794_v47 = vld [vmem:[#allocation9 + $0x1d8] sm:$0xff]  ;;  %v777_v50 = vld [vmem:[#allocation9 + $0x150] sm:$0xff]  ;;  %v795_v54 = vld [vmem:[#allocation9 + $0x1e0] sm:$0xff]  ;;  %950 = vmatprep.mubr.f32.mxu1 %v534_v53 }
  0xac   : > { %v2233_v49 = vpack.c.bf16 %v794_v47, %v793_v46  ;;  %v778_v51 = vld [vmem:[#allocation9 + $0x158] sm:$0xff]  ;;  %v796_v55 = vld [vmem:[#allocation9 + $0x1e8] sm:$0xff]  ;;  %v518_v56 = vld [vmem:[#allocation2] sm:$0xff] }
  0xad   : > { %2176 = vmatpush3.bf16.msra.mxu0 %v2173_v48  ;;  %2204 = vmatpush3.bf16.msra.mxu1 %v2203_v63  ;;  %v2211_v48 = vpack.c.bf16 %v750_v45, %v749_v44  ;;  %v2235_v52 = vpack.c.bf16 %v778_v51, %v777_v50  ;;  %v779_v58 = vld [vmem:[#allocation9 + $0x160] sm:$0xff]  ;;  %v780_v59 = vld [vmem:[#allocation9 + $0x168] sm:$0xff]  ;;  %v798_v1 = vld [vmem:[#allocation9 + $0x1f8] sm:$0xff] }
  0xae   : > { %2178 = vmatprep.subr.bf16.mxu0 %v2177_v57  ;;  %2206 = vmatprep.subr.bf16.mxu1 %v2205_v34  ;;  %v2239_v60 = vpack.c.bf16 %v780_v59, %v779_v58  ;;  %v815_v61 = vld [vmem:[#allocation9 + $0x280] sm:$0xff]  ;;  %v816_v62 = vld [vmem:[#allocation9 + $0x288] sm:$0xff]  ;;  %v817_v9 = vld [vmem:[#allocation9 + $0x290] sm:$0xff] }
  0xaf   : > { %v2245_v63 = vpack.c.bf16 %v816_v62, %v815_v61  ;;  %v799_v2 = vld [vmem:[#allocation9 + $0x200] sm:$0xff]  ;;  %v800_v4 = vld [vmem:[#allocation9 + $0x208] sm:$0xff]  ;;  %v818_v10 = vld [vmem:[#allocation9 + $0x298] sm:$0xff] }
  0xb0   : > { %v2249_v11 = vpack.c.bf16 %v818_v10, %v817_v9  ;;  %v801_v12 = vld [vmem:[#allocation9 + $0x210] sm:$0xff]  ;;  %v819_v18 = vld [vmem:[#allocation9 + $0x2a0] sm:$0xff]  ;;  %v820_v19 = vld [vmem:[#allocation9 + $0x2a8] sm:$0xff] }
  0xb1   : > { %2180 = vmatpush3.bf16.msra.mxu0 %v2177_v57  ;;  %2208 = vmatpush3.bf16.msra.mxu1 %v2207_v37  ;;  %v2237_v57 = vpack.c.bf16 %v796_v55, %v795_v54  ;;  %v2253_v20 = vpack.c.bf16 %v820_v19, %v819_v18  ;;  %v822_v25 = vld [vmem:[#allocation9 + $0x2b8] sm:$0xff]  ;;  %v805_v27 = vld [vmem:[#allocation9 + $0x230] sm:$0xff]  ;;  %v807_v33 = vld [vmem:[#allocation9 + $0x240] sm:$0xff] }
  0xb2   : > { %2214 = vmatprep.subr.bf16.mxu0 %v2213_v0  ;;  %2210 = vmatprep.subr.bf16.mxu1 %v2209_v43  ;;  %v797_v0 = vld [vmem:[#allocation9 + $0x1f0] sm:$0xff]  ;;  %v806_v28 = vld [vmem:[#allocation9 + $0x238] sm:$0xff]  ;;  %v808_v34 = vld [vmem:[#allocation9 + $0x248] sm:$0xff] }
  0xb3   : > { %v2241_v3 = vpack.c.bf16 %v798_v1, %v797_v0  ;;  %v2263_v35 = vpack.c.bf16 %v808_v34, %v807_v33  ;;  %v825_v36 = vld [vmem:[#allocation9 + $0x2d0] sm:$0xff]  ;;  %v826_v37 = vld [vmem:[#allocation9 + $0x2d8] sm:$0xff]  ;;  %v827_v42 = vld [vmem:[#allocation9 + $0x2e0] sm:$0xff] }
  0xb4   : > { %2050 = vmatmul.mubr.f32.vlgmr.msra.gmra.mrb[0].mxu0 %v366_v5  ;;  %v781_v5 = vld [vmem:[#allocation9 + $0x170] sm:$0xff]  ;;  %v2265_v38 = vpack.c.bf16 %v826_v37, %v825_v36  ;;  %v828_v43 = vld [vmem:[#allocation9 + $0x2e8] sm:$0xff]  ;;  %v811_v45 = vld [vmem:[#allocation9 + $0x260] sm:$0xff] }
  0xb5   : > { %2052 = vmatprep.mubr.f32.mxu0 %v367_v7  ;;  %2216 = vmatpush3.bf16.msra.mxu0 %v2215_v6  ;;  %v782_v6 = vld [vmem:[#allocation9 + $0x178] sm:$0xff]  ;;  %v2247_v7 = vpack.c.bf16 %v800_v4, %v799_v2  ;;  %v809_v39 = vld [vmem:[#allocation9 + $0x250] sm:$0xff]  ;;  %v2269_v44 = vpack.c.bf16 %v828_v43, %v827_v42  ;;  %v812_v46 = vld [vmem:[#allocation9 + $0x268] sm:$0xff] }
  0xb6   : > { %2218 = vmatprep.subr.bf16.mxu0 %v2217_v8  ;;  %2212 = vmatpush3.bf16.msra.mxu1 %v2211_v48  ;;  %v2243_v8 = vpack.c.bf16 %v782_v6, %v781_v5  ;;  %v2271_v47 = vpack.c.bf16 %v812_v46, %v811_v45  ;;  %v829_v48 = vld [vmem:[#allocation9 + $0x2f0] sm:$0xff]  ;;  %v863_v54 = vld [vmem:[#allocation9 + $0x400] sm:$0xff]  ;;  %v864_v55 = vld [vmem:[#allocation9 + $0x408] sm:$0xff] }
  0xb7   : > { %2246 = vmatprep.subr.bf16.mxu1 %v2245_v63  ;;  %v813_v51 = vld [vmem:[#allocation9 + $0x270] sm:$0xff]  ;;  %v831_v9 = vld [vmem:[#allocation9 + $0x300] sm:$0xff]  ;;  %v832_v10 = vld [vmem:[#allocation9 + $0x308] sm:$0xff] }
  0xb8   : > { %2053 = vmatmul.mubr.f32.gmra.mrb[2].mxu0 %v368_v13  ;;  %v802_v13 = vld [vmem:[#allocation9 + $0x218] sm:$0xff]  ;;  %v835_v34 = vld [vmem:[#allocation9 + $0x320] sm:$0xff]  ;;  %v853_v37 = vld [vmem:[#allocation9 + $0x3b0] sm:$0xff] }
  0xb9   : > { %2055 = vmatprep.mubr.f32.mxu0 %v369_v15  ;;  %2220 = vmatpush3.bf16.msra.mxu0 %v2219_v14  ;;  %v847_v14 = vld [vmem:[#allocation9 + $0x380] sm:$0xff]  ;;  %v2251_v15 = vpack.c.bf16 %v802_v13, %v801_v12  ;;  %v849_v12 = vld [vmem:[#allocation9 + $0x390] sm:$0xff]  ;;  %v850_v13 = vld [vmem:[#allocation9 + $0x398] sm:$0xff] }
  0xba   : > { %2222 = vmatprep.subr.bf16.mxu0 %v2221_v16  ;;  %951 = vmatmul.mubr.f32.vlgmr.msra.gmra.mrb[0].mxu1 %v518_v56  ;;  %v848_v16 = vld [vmem:[#allocation9 + $0x388] sm:$0xff]  ;;  %v2947_v56 = vpack.c.bf16 %v864_v55, %v863_v54  ;;  %v838_v42 = vld [vmem:[#allocation9 + $0x338] sm:$0xff] }
  0xbb   : > { %2248 = vmatpush3.bf16.msra.mxu1 %v2247_v7  ;;  %v2277_v17 = vpack.c.bf16 %v848_v16, %v847_v14  ;;  %v856_v45 = vld [vmem:[#allocation9 + $0x3c8] sm:$0xff]  ;;  %v858_v54 = vld [vmem:[#allocation9 + $0x3d8] sm:$0xff] }
  0xbc   : > { %2056 = vmatmul.mubr.f32.gmra.mrb[4].mxu0 %v370_v21  ;;  %2250 = vmatprep.subr.bf16.mxu1 %v2249_v11  ;;  %v803_v21 = vld [vmem:[#allocation9 + $0x220] sm:$0xff] }
  0xbd   : > { %2058 = vmatprep.mubr.f32.mxu0 %v371_v23  ;;  %2224 = vmatpush3.bf16.msra.mxu0 %v2223_v22  ;;  %v804_v22 = vld [vmem:[#allocation9 + $0x228] sm:$0xff] }
  0xbe   : > { %2226 = vmatprep.subr.bf16.mxu0 %v2225_v24  ;;  %v2255_v23 = vpack.c.bf16 %v804_v22, %v803_v21  ;;  %v821_v24 = vld [vmem:[#allocation9 + $0x2b0] sm:$0xff]  ;;  %v834_v22 = vld [vmem:[#allocation9 + $0x318] sm:$0xff] }
  0xbf   : > { %2252 = vmatpush3.bf16.msra.mxu1 %v2251_v15  ;;  %v2257_v26 = vpack.c.bf16 %v822_v25, %v821_v24  ;;  %v550_v15 = vld [vmem:[#allocation2 + $0x2] sm:$0xff]  ;;  %v833_v21 = vld [vmem:[#allocation9 + $0x310] sm:$0xff] }
  0xc0   : > { %2059 = vmatmul.mubr.f32.gmra.mrb[6].mxu0 %v372_v29  ;;  %2254 = vmatprep.subr.bf16.mxu1 %v2253_v20  ;;  %v2259_v29 = vpack.c.bf16 %v806_v28, %v805_v27  ;;  %v2281_v20 = vpack.c.bf16 %v850_v13, %v849_v12  ;;  %v851_v25 = vld [vmem:[#allocation9 + $0x3a0] sm:$0xff] }
  0xc1   : > { %2228 = vmatpush3.bf16.msra.mxu0 %v2227_v30  ;;  %v823_v30 = vld [vmem:[#allocation9 + $0x2c0] sm:$0xff] }
  0xc2   : > { %2230 = vmatprep.subr.bf16.mxu0 %v2229_v31  ;;  %v824_v31 = vld [vmem:[#allocation9 + $0x2c8] sm:$0xff] }
  0xc3   : > { %2256 = vmatpush3.bf16.msra.mxu1 %v2255_v23  ;;  %v2261_v32 = vpack.c.bf16 %v824_v31, %v823_v30  ;;  %v2283_v30 = vpack.c.bf16 %v834_v22, %v833_v21 }
  0xc4   : > { %2258 = vmatprep.subr.bf16.mxu1 %v2257_v26  ;;  %v852_v26 = vld [vmem:[#allocation9 + $0x3a8] sm:$0xff] }
  0xc5   : > { %2232 = vmatpush3.bf16.msra.mxu0 %v2231_v40  ;;  %v810_v40 = vld [vmem:[#allocation9 + $0x258] sm:$0xff]  ;;  %v2285_v33 = vpack.c.bf16 %v852_v26, %v851_v25  ;;  %v867_v25 = vld [vmem:[#allocation9 + $0x420] sm:$0xff]  ;;  %v868_v26 = vld [vmem:[#allocation9 + $0x428] sm:$0xff] }
  0xc6   : > { %2234 = vmatprep.subr.bf16.mxu0 %v2233_v49  ;;  %v2267_v41 = vpack.c.bf16 %v810_v40, %v809_v39  ;;  %v830_v49 = vld [vmem:[#allocation9 + $0x2f8] sm:$0xff] }
  0xc7   : > { %2260 = vmatpush3.bf16.msra.mxu1 %v2259_v29  ;;  %v2273_v50 = vpack.c.bf16 %v830_v49, %v829_v48 }
  0xc8   : > { %2262 = vmatprep.subr.bf16.mxu1 %v2261_v32 }
  0xc9   : > { %2236 = vmatpush3.bf16.msra.mxu0 %v2235_v52  ;;  %v814_v52 = vld [vmem:[#allocation9 + $0x278] sm:$0xff] }
  0xca   : > { %2238 = vmatprep.subr.bf16.mxu0 %v2237_v57  ;;  %v2275_v53 = vpack.c.bf16 %v814_v52, %v813_v51  ;;  %v1711_v57 = vld [vmem:[%s3146_s2] ss:$0 sm:$0xff]  ;;  %v840_v51 = vld [vmem:[#allocation9 + $0x348] sm:$0xff] }
  0xcb   : > { %2264 = vmatpush3.bf16.msra.mxu1 %v2263_v35  ;;  %v836_v35 = vld [vmem:[#allocation9 + $0x328] sm:$0xff] }
  0xcc   : > { %2266 = vmatprep.subr.bf16.mxu1 %v2265_v38  ;;  %v854_v38 = vld [vmem:[#allocation9 + $0x3b8] sm:$0xff]  ;;  %v2287_v39 = vpack.c.bf16 %v836_v35, %v835_v34  ;;  %v872_v34 = vld [vmem:[#allocation9 + $0x448] sm:$0xff] }
  0xcd   : > { %2240 = vmatpush3.bf16.msra.mxu0 %v2239_v60  ;;  %v2289_v40 = vpack.c.bf16 %v854_v38, %v853_v37  ;;  %v874_v35 = vld [vmem:[#allocation9 + $0x458] sm:$0xff]  ;;  %v877_v37 = vld [vmem:[#allocation9 + $0x470] sm:$0xff] }
  0xce   : > { %2242 = vmatprep.subr.bf16.mxu0 %v2241_v3  ;;  %v878_v38 = vld [vmem:[#allocation9 + $0x478] sm:$0xff] }
  0xcf   : > { %2268 = vmatpush3.bf16.msra.mxu1 %v2267_v41  ;;  %v837_v41 = vld [vmem:[#allocation9 + $0x330] sm:$0xff] }
  0xd0   : > { %2270 = vmatprep.subr.bf16.mxu1 %v2269_v44  ;;  %v855_v44 = vld [vmem:[#allocation9 + $0x3c0] sm:$0xff] }
  0xd1   : > { %2244 = vmatpush3.bf16.msra.mxu0 %v2243_v8  ;;  %v2293_v49 = vpack.c.bf16 %v856_v45, %v855_v44  ;;  %v1420_v44 = vld [vmem:[#allocation10 + $0x8] sm:$0xff] }
  0xd2   : > { %2278 = vmatprep.subr.bf16.mxu0 %v2277_v17  ;;  %v2279_v17 = vpack.c.bf16 %v832_v10, %v831_v9  ;;  %v861_v10 = vld [vmem:[#allocation9 + $0x3f0] sm:$0xff] }
  0xd3   : > { %2272 = vmatpush3.bf16.msra.mxu1 %v2271_v47  ;;  %v2291_v47 = vpack.c.bf16 %v838_v42, %v837_v41 }
  0xd4   : > { %2274 = vmatprep.subr.bf16.mxu1 %v2273_v50  ;;  %v839_v50 = vld [vmem:[#allocation9 + $0x340] sm:$0xff] }
  0xd5   : > { %v2295_v55 = vpack.c.bf16 %v840_v51, %v839_v50  ;;  %v1424_v50 = vld [vmem:[#allocation10 + $0x28] sm:$0xff] }
  0xd7   : > { %2276 = vmatpush3.bf16.msra.mxu1 %v2275_v53  ;;  %v857_v53 = vld [vmem:[#allocation9 + $0x3d0] sm:$0xff] }
  0xd8   : > { %2310 = vmatprep.subr.bf16.mxu1 %v2947_v56 }
 0x187   : > { %v2051_v58 = vpop.f32.mrb[0].mxu0 }
 0x188   : > { %v468_v59 = vadd.f32 %v2051_v58, %v1711_v57  ;;  %v462_v60 = vpop.f32.mrb[1].mxu0  ;;  %v841_v58 = vld [vmem:[#allocation9 + $0x350] sm:$0xff] }
 0x189   : > { %v463_v61 = vadd.f32 %v1711_v57, %v462_v60 }
 0x18a   : > { %v2953_v62 = vmax.f32 %v468_v59, 0.0  ;;  %v842_v59 = vld [vmem:[#allocation9 + $0x358] sm:$0xff] }
 0x18b   : > { %v2955_v63 = vmax.f32 %v463_v61, 0.0  ;;  %v2054_v0 = vpop.f32.mrb[2].mxu0  ;;  %v859_v61 = vld [vmem:[#allocation9 + $0x3e0] sm:$0xff] }
 0x18c   : > { %511 = vst [vmem:[#allocation2 + $0x21] sm:$0xff] %v2953_v62  ;;  %v478_v1 = vadd.f32 %v2054_v0, %v1711_v57  ;;  %v472_v2 = vpop.f32.mrb[3].mxu0  ;;  %v860_v0 = vld [vmem:[#allocation9 + $0x3e8] sm:$0xff] }
 0x18d   : > { %510 = vst [vmem:[#allocation2 + $0x11] sm:$0xff] %v2955_v63  ;;  %v473_v3 = vadd.f32 %v1711_v57, %v472_v2  ;;  %955 = vmatprep.mubr.f32.mxu1 %v2955_v63  ;;  %v2299_v2 = vpack.c.bf16 %v842_v59, %v841_v58  ;;  %v1429_v59 = vld [vmem:[#allocation10 + $0x50] sm:$0xff] }
 0x18e   : > { %v2960_v4 = vmax.f32 %v478_v1, 0.0 }
 0x18f   : > { %v2962_v5 = vmax.f32 %v473_v3, 0.0  ;;  %v2057_v6 = vpop.f32.mrb[4].mxu0 }
 0x190   : > { %513 = vst [vmem:[#allocation2 + $0x41] sm:$0xff] %v2960_v4  ;;  %v488_v7 = vadd.f32 %v2057_v6, %v1711_v57  ;;  %v482_v8 = vpop.f32.mrb[5].mxu0  ;;  %v2301_v6 = vpack.c.bf16 %v860_v0, %v859_v61  ;;  %v1431_v0 = vld [vmem:[#allocation10 + $0x60] sm:$0xff] }
 0x191   : > { %512 = vst [vmem:[#allocation2 + $0x31] sm:$0xff] %v2962_v5  ;;  %v483_v11 = vadd.f32 %v1711_v57, %v482_v8  ;;  %v844_v8 = vld [vmem:[#allocation9 + $0x368] sm:$0xff] }
 0x192   : > { %v2966_v14 = vmax.f32 %v488_v7, 0.0  ;;  %v843_v7 = vld [vmem:[#allocation9 + $0x360] sm:$0xff] }
 0x193   : > { %v2968_v16 = vmax.f32 %v483_v11, 0.0  ;;  %v2060_v18 = vpop.f32.mrb[6].mxu0  ;;  %v2973_v28 = vld [vmem:[#allocation2 + $0x20] sm:$0xff]  ;;  %v862_v11 = vld [vmem:[#allocation9 + $0x3f8] sm:$0xff]  ;;  %v2303_v12 = vpack.c.bf16 %v844_v8, %v843_v7 }
 0x194   : > { %v566_v19 = vld [vmem:[#allocation2 + $0x10] sm:$0xff]  ;;  %515 = vst [vmem:[#allocation2 + $0x61] sm:$0xff] %v2966_v14  ;;  %v498_v23 = vadd.f32 %v2060_v18, %v1711_v57  ;;  %v492_v24 = vpop.f32.mrb[7].mxu0  ;;  %v2991_v43 = vld [vmem:[#allocation2 + $0x22] sm:$0xff]  ;;  %v2305_v13 = vpack.c.bf16 %v862_v11, %v861_v10  ;;  %v1712_v8 = vld [vmem:[%s3148_s4] ss:$0 sm:$0xff] }
 0x195   : > { %1055 = vmatprep.mubr.f32.mxu0 %v566_v19  ;;  %956 = vmatmul.mubr.f32.gmra.mrb[2].mxu1 %v566_v19  ;;  %514 = vst [vmem:[#allocation2 + $0x51] sm:$0xff] %v2968_v16  ;;  %v493_v27 = vadd.f32 %v1711_v57, %v492_v24  ;;  %v2984_v36 = vld [vmem:[#allocation2 + $0x12] sm:$0xff]  ;;  %v2297_v57 = vpack.c.bf16 %v858_v54, %v857_v53 }
 0x196   : > { %1056 = vmatmul.mubr.f32.vlgmr.msra.gmra.mrb[8].mxu0 %v550_v15  ;;  %960 = vmatprep.mubr.f32.mxu1 %v2953_v62  ;;  %v2975_v29 = vmax.f32 %v498_v23, 0.0  ;;  %v845_v15 = vld [vmem:[#allocation9 + $0x370] sm:$0xff]  ;;  %v1426_v53 = vld [vmem:[#allocation10 + $0x38] sm:$0xff] }
 0x197   : > { %1060 = vmatprep.mubr.f32.mxu0 %v2973_v28  ;;  %2280 = vmatpush3.bf16.msra.mxu0 %v2279_v17  ;;  %v2978_v31 = vmax.f32 %v493_v27, 0.0  ;;  %v2995_v46 = vld [vmem:[#allocation2 + $0x40] sm:$0xff]  ;;  %v846_v17 = vld [vmem:[#allocation9 + $0x378] sm:$0xff]  ;;  %v865_v19 = vld [vmem:[#allocation9 + $0x410] sm:$0xff]  ;;  %v2317_v27 = vpack.c.bf16 %v868_v26, %v867_v25 }
 0x198   : > { %2282 = vmatprep.subr.bf16.mxu0 %v2281_v20  ;;  %v2980_v32 = vld [vmem:[#allocation2 + $0x30] sm:$0xff]  ;;  %517 = vst [vmem:[#allocation2 + $0x81] sm:$0xff] %v2975_v29  ;;  %v3007_v60 = vld [vmem:[#allocation2 + $0x42] sm:$0xff]  ;;  %v866_v20 = vld [vmem:[#allocation9 + $0x418] sm:$0xff]  ;;  %v2307_v22 = vpack.c.bf16 %v846_v17, %v845_v15 }
 0x199   : > { %961 = vmatmul.mubr.f32.gmra.mrb[4].mxu1 %v2973_v28  ;;  %516 = vst [vmem:[#allocation2 + $0x71] sm:$0xff] %v2978_v31  ;;  %v3001_v52 = vld [vmem:[#allocation2 + $0x32] sm:$0xff]  ;;  %v2313_v23 = vpack.c.bf16 %v866_v20, %v865_v19 }
 0x19a   : > { %1061 = vmatmul.mubr.f32.gmra.mrb[10].mxu0 %v2984_v36  ;;  %965 = vmatprep.mubr.f32.mxu1 %v2962_v5 }
 0x19b   : > { %2284 = vmatpush3.bf16.msra.mxu0 %v2283_v30  ;;  %1065 = vmatprep.mubr.f32.mxu0 %v2980_v32  ;;  %v3011_v1 = vld [vmem:[#allocation2 + $0x60] sm:$0xff]  ;;  %v869_v30 = vld [vmem:[#allocation9 + $0x430] sm:$0xff] }
 0x19c   : > { %2286 = vmatprep.subr.bf16.mxu0 %v2285_v33  ;;  %v2998_v48 = vld [vmem:[#allocation2 + $0x50] sm:$0xff]  ;;  %v3023_v18 = vld [vmem:[#allocation2 + $0x62] sm:$0xff]  ;;  %v870_v33 = vld [vmem:[#allocation9 + $0x438] sm:$0xff] }
 0x19d   : > { %966 = vmatmul.mubr.f32.gmra.mrb[6].mxu1 %v2980_v32  ;;  %v3017_v9 = vld [vmem:[#allocation2 + $0x52] sm:$0xff] }
 0x19e   : > { %1066 = vmatmul.mubr.f32.gmra.mrb[12].mxu0 %v2991_v43  ;;  %970 = vmatprep.mubr.f32.mxu1 %v2960_v4 }
 0x19f   : > { %1070 = vmatprep.mubr.f32.mxu0 %v2995_v46  ;;  %2288 = vmatpush3.bf16.msra.mxu0 %v2287_v39  ;;  %v3026_v21 = vld [vmem:[#allocation2 + $0x80] sm:$0xff] }
 0x1a0   : > { %2290 = vmatprep.subr.bf16.mxu0 %v2289_v40  ;;  %v3014_v3 = vld [vmem:[#allocation2 + $0x70] sm:$0xff]  ;;  %v605_v39 = vld [vmem:[#allocation2 + $0x82] sm:$0xff] }
 0x1a1   : > { %971 = vmatmul.mubr.f32.gmra.mrb[8].mxu1 %v2995_v46  ;;  %v3030_v24 = vld [vmem:[#allocation2 + $0x72] sm:$0xff] }
 0x1a2   : > { %1071 = vmatmul.mubr.f32.gmra.mrb[14].mxu0 %v3001_v52  ;;  %975 = vmatprep.mubr.f32.mxu1 %v2968_v16  ;;  %v622_v40 = vld [vmem:[#allocation2 + $0x90] sm:$0xff] }
 0x1a3   : > { %2292 = vmatpush3.bf16.msra.mxu0 %v2291_v47  ;;  %1075 = vmatprep.mubr.f32.mxu0 %v2998_v48  ;;  %v1422_v47 = vld [vmem:[#allocation10 + $0x18] sm:$0xff] }
 0x1a4   : > { %2294 = vmatprep.subr.bf16.mxu0 %v2293_v49  ;;  %v1423_v49 = vld [vmem:[#allocation10 + $0x20] sm:$0xff] }
 0x1a5   : > { %976 = vmatmul.mubr.f32.gmra.mrb[10].mxu1 %v2998_v48  ;;  %v2349_v51 = vpack.c.bf16 %v1424_v50, %v1423_v49 }
 0x1a6   : > { %1076 = vmatmul.mubr.f32.gmra.mrb[16].mxu0 %v3007_v60  ;;  %980 = vmatprep.mubr.f32.mxu1 %v2966_v14 }
 0x1a7   : > { %1080 = vmatprep.mubr.f32.mxu0 %v3011_v1  ;;  %2296 = vmatpush3.bf16.msra.mxu0 %v2295_v55  ;;  %v1427_v55 = vld [vmem:[#allocation10 + $0x40] sm:$0xff] }
 0x1a8   : > { %2298 = vmatprep.subr.bf16.mxu0 %v2297_v57  ;;  %v1428_v57 = vld [vmem:[#allocation10 + $0x48] sm:$0xff] }
 0x1a9   : > { %981 = vmatmul.mubr.f32.gmra.mrb[12].mxu1 %v3011_v1  ;;  %v2357_v58 = vpack.c.bf16 %v1428_v57, %v1427_v55 }
 0x1aa   : > { %1081 = vmatmul.mubr.f32.gmra.mrb[18].mxu0 %v3017_v9  ;;  %985 = vmatprep.mubr.f32.mxu1 %v2978_v31 }
 0x1ab   : > { %2300 = vmatpush3.bf16.msra.mxu0 %v2299_v2  ;;  %1085 = vmatprep.mubr.f32.mxu0 %v3014_v3 }
 0x1ac   : > { %2302 = vmatprep.subr.bf16.mxu0 %v2301_v6  ;;  %v1434_v6 = vld [vmem:[#allocation10 + $0x78] sm:$0xff] }
 0x1ad   : > { %986 = vmatmul.mubr.f32.gmra.mrb[14].mxu1 %v3014_v3 }
 0x1ae   : > { %1086 = vmatmul.mubr.f32.gmra.mrb[20].mxu0 %v3023_v18  ;;  %1160 = vmatprep.mubr.f32.mxu1 %v2984_v36  ;;  %v876_v36 = vld [vmem:[#allocation9 + $0x468] sm:$0xff] }
 0x1af   : > { %1090 = vmatprep.mubr.f32.mxu0 %v3026_v21  ;;  %2304 = vmatpush3.bf16.msra.mxu0 %v2303_v12 }
 0x1b0   : > { %2306 = vmatprep.subr.bf16.mxu0 %v2305_v13 }
 0x1b1   : > { %1161 = vmatmul.mubr.f32.vlgmr.msra.gmra.mrb[16].mxu1 %v2955_v63  ;;  %v871_v63 = vld [vmem:[#allocation9 + $0x440] sm:$0xff] }
 0x1b2   : > { %1091 = vmatmul.mubr.f32.gmra.mrb[22].mxu0 %v3030_v24  ;;  %2312 = vmatpush3.bf16.msra.mxu1 %v2947_v56  ;;  %v2321_v56 = vpack.c.bf16 %v870_v33, %v869_v30 }
 0x1b3   : > { %1165 = vmatprep.mubr.f32.mxu1 %v2991_v43  ;;  %2308 = vmatpush3.bf16.msra.mxu0 %v2307_v22 }
 0x1b4   : > { %1265 = vmatprep.mubr.f32.mxu0 %v2953_v62  ;;  %2314 = vmatprep.subr.bf16.mxu1 %v2313_v23 }
 0x1b5   : > { %1166 = vmatmul.mubr.f32.gmra.mrb[18].mxu1 %v2953_v62  ;;  %v2325_v62 = vpack.c.bf16 %v872_v34, %v871_v63 }
 0x1b6   : > { %1266 = vmatmul.mubr.f32.vlgmr.msra.gmra.mrb[24].mxu0 %v2973_v28  ;;  %2316 = vmatpush3.bf16.msra.mxu1 %v2313_v23  ;;  %v873_v28 = vld [vmem:[#allocation9 + $0x450] sm:$0xff] }
 0x1b7   : > { %1170 = vmatprep.mubr.f32.mxu1 %v3001_v52  ;;  %1270 = vmatprep.mubr.f32.mxu0 %v2962_v5 }
 0x1b8   : > { %2318 = vmatprep.subr.bf16.mxu1 %v2317_v27 }
 0x1b9   : > { %1171 = vmatmul.mubr.f32.gmra.mrb[20].mxu1 %v2962_v5  ;;  %v2329_v5 = vpack.c.bf16 %v874_v35, %v873_v28 }
 0x1ba   : > { %1271 = vmatmul.mubr.f32.gmra.mrb[26].mxu0 %v2980_v32  ;;  %2320 = vmatpush3.bf16.msra.mxu1 %v2317_v27  ;;  %v875_v32 = vld [vmem:[#allocation9 + $0x460] sm:$0xff] }
 0x1bb   : > { %1175 = vmatprep.mubr.f32.mxu1 %v3007_v60  ;;  %1275 = vmatprep.mubr.f32.mxu0 %v2960_v4 }
 0x1bc   : > { %2322 = vmatprep.subr.bf16.mxu1 %v2321_v56 }
 0x1bd   : > { %1176 = vmatmul.mubr.f32.gmra.mrb[22].mxu1 %v2960_v4  ;;  %v2333_v4 = vpack.c.bf16 %v876_v36, %v875_v32 }
 0x1be   : > { %1276 = vmatmul.mubr.f32.gmra.mrb[28].mxu0 %v2995_v46  ;;  %2324 = vmatpush3.bf16.msra.mxu1 %v2321_v56  ;;  %v1421_v46 = vld [vmem:[#allocation10 + $0x10] sm:$0xff] }
 0x1bf   : > { %1180 = vmatprep.mubr.f32.mxu1 %v3017_v9  ;;  %1280 = vmatprep.mubr.f32.mxu0 %v2968_v16 }
 0x1c0   : > { %2326 = vmatprep.subr.bf16.mxu1 %v2325_v62 }
 0x1c1   : > { %1181 = vmatmul.mubr.f32.gmra.mrb[24].mxu1 %v2968_v16  ;;  %v2337_v16 = vpack.c.bf16 %v878_v38, %v877_v37 }
 0x1c2   : > { %1281 = vmatmul.mubr.f32.gmra.mrb[30].mxu0 %v2998_v48  ;;  %2328 = vmatpush3.bf16.msra.mxu1 %v2325_v62  ;;  %v2345_v48 = vpack.c.bf16 %v1422_v47, %v1421_v46 }
 0x1c3   : > { %1185 = vmatprep.mubr.f32.mxu1 %v3023_v18  ;;  %1285 = vmatprep.mubr.f32.mxu0 %v2966_v14 }
 0x1c4   : > { %2330 = vmatprep.subr.bf16.mxu1 %v2329_v5 }
 0x1c5   : > { %1186 = vmatmul.mubr.f32.gmra.mrb[26].mxu1 %v2966_v14  ;;  %v638_v14 = vld [vmem:[#allocation2 + $0x91] sm:$0xff] }
 0x1c6   : > { %1286 = vmatmul.mubr.f32.gmra.mrb[32].mxu0 %v3011_v1  ;;  %2332 = vmatpush3.bf16.msra.mxu1 %v2329_v5  ;;  %v1432_v1 = vld [vmem:[#allocation10 + $0x68] sm:$0xff] }
 0x1c7   : > { %1190 = vmatprep.mubr.f32.mxu1 %v3030_v24  ;;  %1290 = vmatprep.mubr.f32.mxu0 %v2978_v31  ;;  %v2365_v2 = vpack.c.bf16 %v1432_v1, %v1431_v0 }
 0x1c8   : > { %2334 = vmatprep.subr.bf16.mxu1 %v2333_v4 }
 0x1c9   : > { %1191 = vmatmul.mubr.f32.gmra.mrb[28].mxu1 %v2978_v31  ;;  %v1777_v31 = vpop.f32.mrb[0].mxu1 }
 0x1ca   : > { %1291 = vmatmul.mubr.f32.gmra.mrb[34].mxu0 %v3014_v3  ;;  %2336 = vmatpush3.bf16.msra.mxu1 %v2333_v4  ;;  %v1778_v41 = vpop.f32.mrb[1].mxu1  ;;  %v1433_v3 = vld [vmem:[#allocation10 + $0x70] sm:$0xff] }
 0x1cb   : > { %1195 = vmatprep.mubr.f32.mxu1 %v605_v39  ;;  %1295 = vmatprep.mubr.f32.mxu0 %v2975_v29  ;;  %v3068_v42 = vadd.f32 %v1778_v41, %v1777_v31  ;;  %v2369_v7 = vpack.c.bf16 %v1434_v6, %v1433_v3 }
 0x1cc   : > { %2338 = vmatprep.subr.bf16.mxu1 %v2337_v16 }
 0x1cd   : > { %1196 = vmatmul.mubr.f32.gmra.mrb[30].mxu1 %v2975_v29  ;;  %v654_v29 = vld [vmem:[#allocation2 + $0x92] sm:$0xff]  ;;  %v953_v15 = vadd.f32 %v3068_v42, %v1712_v8 }
 0x1ce   : > { %1296 = vmatmul.mubr.f32.gmra.mrb[36].mxu0 %v3026_v21  ;;  %2340 = vmatpush3.bf16.msra.mxu1 %v2337_v16 }
 0x1cf   : > { %2093 = vmatprep.mubr.f32.mxu1 %v2991_v43  ;;  %1300 = vmatprep.mubr.f32.mxu0 %v638_v14  ;;  %v1419_v43 = vld [vmem:[#allocation10] sm:$0xff] }
 0x1d0   : > { %v2341_v45 = vpack.c.bf16 %v1420_v44, %v1419_v43 }
 0x1d1   : > { %2094 = vmatmul.mubr.f32.vlgmr.msra.gmra.mrb[32].mxu1 %v3001_v52  ;;  %v1425_v52 = vld [vmem:[#allocation10 + $0x30] sm:$0xff] }
 0x1d2   : > { %1301 = vmatmul.mubr.f32.gmra.mrb[38].mxu0 %v622_v40  ;;  %2096 = vmatprep.mubr.f32.mxu1 %v3007_v60  ;;  %v2353_v54 = vpack.c.bf16 %v1426_v53, %v1425_v52  ;;  %v1430_v60 = vld [vmem:[#allocation10 + $0x58] sm:$0xff] }
 0x1d3   : > { %2342 = vmatprep.subr.bf16.mxu0 %v2341_v45  ;;  %2373 = vmatprep.subr.bf16.mxu1 %v2341_v45  ;;  %v2361_v61 = vpack.c.bf16 %v1430_v60, %v1429_v59 }
 0x1d4   : > { %2344 = vmatpush3.bf16.msra.mxu0 %v2341_v45  ;;  %2381 = vmatpush3.bf16.msra.mxu1 %v2341_v45 }
 0x1d5   : > { %2097 = vmatmul.mubr.f32.gmra.mrb[34].mxu1 %v3017_v9  ;;  %2346 = vmatprep.subr.bf16.mxu0 %v2345_v48 }
 0x1d6   : > { %2099 = vmatprep.mubr.f32.mxu1 %v3023_v18  ;;  %2374 = vmatprep.subr.bf16.mxu1 %v2345_v48 }
 0x1d8   : > { %2348 = vmatpush3.bf16.msra.mxu0 %v2345_v48  ;;  %2382 = vmatpush3.bf16.msra.mxu1 %v2345_v48 }
 0x1d9   : > { %2100 = vmatmul.mubr.f32.gmra.mrb[36].mxu1 %v3030_v24  ;;  %2350 = vmatprep.subr.bf16.mxu0 %v2349_v51 }
 0x1da   : > { %2102 = vmatprep.mubr.f32.mxu1 %v605_v39  ;;  %2375 = vmatprep.subr.bf16.mxu1 %v2349_v51 }
 0x1dc   : > { %2352 = vmatpush3.bf16.msra.mxu0 %v2349_v51  ;;  %2383 = vmatpush3.bf16.msra.mxu1 %v2349_v51 }
 0x1dd   : > { %2103 = vmatmul.mubr.f32.gmra.mrb[38].mxu1 %v654_v29  ;;  %2354 = vmatprep.subr.bf16.mxu0 %v2353_v54 }
 0x1de   : > { %2376 = vmatprep.subr.bf16.mxu1 %v2353_v54 }
 0x1e0   : > { %2356 = vmatpush3.bf16.msra.mxu0 %v2353_v54  ;;  %2384 = vmatpush3.bf16.msra.mxu1 %v2353_v54 }
 0x1e1   : > { %2358 = vmatprep.subr.bf16.mxu0 %v2357_v58  ;;  %2377 = vmatprep.subr.bf16.mxu1 %v2357_v58 }
 0x1e4   : > { %2360 = vmatpush3.bf16.msra.mxu0 %v2357_v58  ;;  %2385 = vmatpush3.bf16.msra.mxu1 %v2357_v58 }
 0x1e5   : > { %2362 = vmatprep.subr.bf16.mxu0 %v2361_v61  ;;  %2378 = vmatprep.subr.bf16.mxu1 %v2361_v61 }
 0x1e8   : > { %2364 = vmatpush3.bf16.msra.mxu0 %v2361_v61  ;;  %2386 = vmatpush3.bf16.msra.mxu1 %v2361_v61 }
 0x1e9   : > { %2366 = vmatprep.subr.bf16.mxu0 %v2365_v2  ;;  %2379 = vmatprep.subr.bf16.mxu1 %v2365_v2 }
 0x1ec   : > { %2368 = vmatpush3.bf16.msra.mxu0 %v2365_v2  ;;  %2387 = vmatpush3.bf16.msra.mxu1 %v2365_v2 }
 0x1ed   : > { %2370 = vmatprep.subr.bf16.mxu0 %v2369_v7  ;;  %2380 = vmatprep.subr.bf16.mxu1 %v2369_v7 }
 0x1f0   : > { %2372 = vmatpush3.bf16.msra.mxu0 %v2369_v7  ;;  %2388 = vmatpush3.bf16.msra.mxu1 %v2369_v7 }
 0x268   : > { %v1780_v9 = vpop.f32.mrb[2].mxu1 }
 0x269   : > { %v1833_v10 = vpop.f32.mrb[8].mxu0  ;;  %v1781_v11 = vpop.f32.mrb[3].mxu1 }
 0x26a   : > { %v1782_v12 = vadd.f32 %v1781_v11, %v1780_v9  ;;  %v1834_v13 = vpop.f32.mrb[9].mxu0 }
 0x26b   : > { %v1835_v17 = vadd.f32 %v1834_v13, %v1833_v10 }
 0x26c   : > { %v1783_v18 = vpop.f32.mrb[4].mxu1  ;;  %v958_v24 = vadd.f32 %v1782_v12, %v1712_v8 }
 0x26d   : > { %v1058_v19 = vadd.f32 %v1835_v17, %v953_v15  ;;  %v1836_v20 = vpop.f32.mrb[10].mxu0  ;;  %v1784_v21 = vpop.f32.mrb[5].mxu1 }
 0x26e   : > { %v1785_v22 = vadd.f32 %v1784_v21, %v1783_v18  ;;  %v1837_v23 = vpop.f32.mrb[11].mxu0 }
 0x26f   : > { %v1838_v25 = vadd.f32 %v1837_v23, %v1836_v20 }
 0x270   : > { %v1786_v26 = vpop.f32.mrb[6].mxu1  ;;  %v963_v34 = vadd.f32 %v1785_v22, %v1712_v8 }
 0x271   : > { %v1063_v27 = vadd.f32 %v1838_v25, %v958_v24  ;;  %v1839_v30 = vpop.f32.mrb[12].mxu0  ;;  %v1787_v33 = vpop.f32.mrb[7].mxu1 }
 0x272   : > { %v1788_v56 = vadd.f32 %v1787_v33, %v1786_v26  ;;  %v1840_v63 = vpop.f32.mrb[13].mxu0 }
 0x273   : > { %v1841_v62 = vadd.f32 %v1840_v63, %v1839_v30 }
 0x274   : > { %v1789_v28 = vpop.f32.mrb[8].mxu1  ;;  %v968_v37 = vadd.f32 %v1788_v56, %v1712_v8 }
 0x275   : > { %v1068_v35 = vadd.f32 %v1841_v62, %v963_v34  ;;  %v1842_v5 = vpop.f32.mrb[14].mxu0  ;;  %v1790_v32 = vpop.f32.mrb[9].mxu1 }
 0x276   : > { %v1791_v36 = vadd.f32 %v1790_v32, %v1789_v28  ;;  %v1843_v4 = vpop.f32.mrb[15].mxu0 }
 0x277   : > { %v1844_v38 = vadd.f32 %v1843_v4, %v1842_v5 }
 0x278   : > { %v1792_v16 = vpop.f32.mrb[10].mxu1  ;;  %v973_v41 = vadd.f32 %v1791_v36, %v1712_v8 }
 0x279   : > { %v1073_v39 = vadd.f32 %v1844_v38, %v968_v37  ;;  %v1845_v14 = vpop.f32.mrb[16].mxu0  ;;  %v1793_v40 = vpop.f32.mrb[11].mxu1 }
 0x27a   : > { %v1794_v29 = vadd.f32 %v1793_v40, %v1792_v16  ;;  %v1846_v31 = vpop.f32.mrb[17].mxu0 }
 0x27b   : > { %v1847_v42 = vadd.f32 %v1846_v31, %v1845_v14 }
 0x27c   : > { %v1795_v43 = vpop.f32.mrb[12].mxu1  ;;  %v978_v49 = vadd.f32 %v1794_v29, %v1712_v8 }
 0x27d   : > { %v1078_v44 = vadd.f32 %v1847_v42, %v973_v41  ;;  %v1848_v45 = vpop.f32.mrb[18].mxu0  ;;  %v1796_v46 = vpop.f32.mrb[13].mxu1 }
 0x27e   : > { %v1797_v47 = vadd.f32 %v1796_v46, %v1795_v43  ;;  %v1849_v48 = vpop.f32.mrb[19].mxu0 }
 0x27f   : > { %v1850_v50 = vadd.f32 %v1849_v48, %v1848_v45 }
 0x280   : > { %v1798_v51 = vpop.f32.mrb[14].mxu1  ;;  %v983_v58 = vadd.f32 %v1797_v47, %v1712_v8 }
 0x281   : > { %v1083_v52 = vadd.f32 %v1850_v50, %v978_v49  ;;  %v1851_v53 = vpop.f32.mrb[20].mxu0  ;;  %v1799_v54 = vpop.f32.mrb[15].mxu1 }
 0x282   : > { %v1800_v55 = vadd.f32 %v1799_v54, %v1798_v51  ;;  %v1852_v57 = vpop.f32.mrb[21].mxu0 }
 0x283   : > { %v1853_v59 = vadd.f32 %v1852_v57, %v1851_v53 }
 0x284   : > { %v1889_v60 = vpop.f32.mrb[16].mxu1  ;;  %v988_v6 = vadd.f32 %v1800_v55, %v1712_v8 }
 0x285   : > { %v1088_v61 = vadd.f32 %v1853_v59, %v983_v58  ;;  %v1854_v0 = vpop.f32.mrb[22].mxu0  ;;  %v1890_v1 = vpop.f32.mrb[17].mxu1 }
 0x286   : > { %v1855_v2 = vpop.f32.mrb[23].mxu0  ;;  %v1891_v3 = vadd.f32 %v1890_v1, %v1889_v60 }
 0x287   : > { %v1856_v7 = vadd.f32 %v1855_v2, %v1854_v0 }
 0x288   : > { %v1163_v9 = vadd.f32 %v1891_v3, %v1058_v19  ;;  %v1892_v10 = vpop.f32.mrb[18].mxu1 }
 0x289   : > { %v1093_v11 = vadd.f32 %v1856_v7, %v988_v6  ;;  %v1945_v12 = vpop.f32.mrb[24].mxu0  ;;  %v1893_v13 = vpop.f32.mrb[19].mxu1 }
 0x28a   : > { %v1894_v15 = vadd.f32 %v1893_v13, %v1892_v10  ;;  %v1946_v17 = vpop.f32.mrb[25].mxu0 }
 0x28b   : > { %v1947_v18 = vadd.f32 %v1946_v17, %v1945_v12 }
 0x28c   : > { %v1168_v20 = vadd.f32 %v1894_v15, %v1063_v27  ;;  %v1895_v21 = vpop.f32.mrb[20].mxu1 }
 0x28d   : > { %v1948_v22 = vpop.f32.mrb[26].mxu0  ;;  %v1896_v23 = vpop.f32.mrb[21].mxu1  ;;  %v1268_v24 = vadd.f32 %v1947_v18, %v1163_v9 }
 0x28e   : > { %v1897_v25 = vadd.f32 %v1896_v23, %v1895_v21  ;;  %v1949_v26 = vpop.f32.mrb[27].mxu0 }
 0x28f   : > { %v1950_v30 = vadd.f32 %v1949_v26, %v1948_v22 }
 0x290   : > { %v1173_v33 = vadd.f32 %v1897_v25, %v1068_v35  ;;  %v1898_v56 = vpop.f32.mrb[22].mxu1 }
 0x291   : > { %v1951_v8 = vpop.f32.mrb[28].mxu0  ;;  %v1899_v63 = vpop.f32.mrb[23].mxu1  ;;  %v1273_v19 = vadd.f32 %v1950_v30, %v1168_v20 }
 0x292   : > { %v1900_v34 = vadd.f32 %v1899_v63, %v1898_v56  ;;  %v1952_v62 = vpop.f32.mrb[29].mxu0 }
 0x293   : > { %v1953_v28 = vadd.f32 %v1952_v62, %v1951_v8  ;;  %v1713_v62 = vld [vmem:[%s3150_s6] ss:$0 sm:$0xff] }
 0x294   : > { %v1178_v5 = vadd.f32 %v1900_v34, %v1073_v39  ;;  %v1901_v32 = vpop.f32.mrb[24].mxu1 }
 0x295   : > { %v1954_v36 = vpop.f32.mrb[30].mxu0  ;;  %v1902_v4 = vpop.f32.mrb[25].mxu1  ;;  %v1278_v27 = vadd.f32 %v1953_v28, %v1173_v33 }
 0x296   : > { %v1903_v37 = vadd.f32 %v1902_v4, %v1901_v32  ;;  %v1955_v38 = vpop.f32.mrb[31].mxu0  ;;  %v1547_v4 = vld [vmem:[%s2921_s20] sm:$0xff] }
 0x297   : > { %v1956_v16 = vadd.f32 %v1955_v38, %v1954_v36 }
 0x298   : > { %v1183_v14 = vadd.f32 %v1903_v37, %v1078_v44  ;;  %v1904_v40 = vpop.f32.mrb[26].mxu1 }
 0x299   : > { %v1957_v29 = vpop.f32.mrb[32].mxu0  ;;  %v1905_v31 = vpop.f32.mrb[27].mxu1  ;;  %v1283_v35 = vadd.f32 %v1956_v16, %v1178_v5  ;;  %v1548_v5 = vld [vmem:[%s2921_s20 + $0x8] sm:$0xff] }
 0x29a   : > { %v1906_v41 = vadd.f32 %v1905_v31, %v1904_v40  ;;  %v1958_v42 = vpop.f32.mrb[33].mxu0 }
 0x29b   : > { %v1959_v43 = vadd.f32 %v1958_v42, %v1957_v29 }
 0x29c   : > { %v1188_v45 = vadd.f32 %v1906_v41, %v1083_v52  ;;  %v1907_v46 = vpop.f32.mrb[28].mxu1 }
 0x29d   : > { %v1960_v47 = vpop.f32.mrb[34].mxu0  ;;  %v1908_v48 = vpop.f32.mrb[29].mxu1  ;;  %v1288_v39 = vadd.f32 %v1959_v43, %v1183_v14  ;;  %v1550_v14 = vld [vmem:[%s2921_s20 + $0x18] sm:$0xff] }
 0x29e   : > { %v1909_v49 = vadd.f32 %v1908_v48, %v1907_v46  ;;  %v1961_v50 = vpop.f32.mrb[35].mxu0 }
 0x29f   : > { %v1962_v51 = vadd.f32 %v1961_v50, %v1960_v47  ;;  %v1552_v47 = vld [vmem:[%s2921_s20 + $0x28] sm:$0xff]  ;;  %v1551_v50 = vld [vmem:[%s2921_s20 + $0x20] sm:$0xff] }
 0x2a0   : > { %v1193_v53 = vadd.f32 %v1909_v49, %v1088_v61  ;;  %v1910_v54 = vpop.f32.mrb[30].mxu1 }
 0x2a1   : > { %v1963_v55 = vpop.f32.mrb[36].mxu0  ;;  %v1911_v57 = vpop.f32.mrb[31].mxu1  ;;  %v1293_v44 = vadd.f32 %v1962_v51, %v1188_v45 }
 0x2a2   : > { %v1912_v58 = vadd.f32 %v1911_v57, %v1910_v54  ;;  %v1964_v59 = vpop.f32.mrb[37].mxu0 }
 0x2a3   : > { %v1965_v60 = vadd.f32 %v1964_v59, %v1963_v55 }
 0x2a4   : > { %v1198_v0 = vadd.f32 %v1912_v58, %v1093_v11  ;;  %v2095_v1 = vpop.f32.mrb[32].mxu1 }
 0x2a5   : > { %v1966_v2 = vpop.f32.mrb[38].mxu0  ;;  %v1378_v3 = vadd.f32 %v2095_v1, %v1273_v19  ;;  %v1372_v52 = vpop.f32.mrb[33].mxu1  ;;  %v1298_v6 = vadd.f32 %v1965_v60, %v1193_v53 }
 0x2a6   : > { %v1967_v7 = vpop.f32.mrb[39].mxu0  ;;  %v1373_v9 = vadd.f32 %v1372_v52, %v1268_v24 }
 0x2a7   : > { %v1968_v10 = vadd.f32 %v1967_v7, %v1966_v2  ;;  %v1412_v15 = vmax.f32 %v1378_v3, 0.0 }
 0x2a8   : > { %v1411_v12 = vmax.f32 %v1373_v9, 0.0  ;;  %v2098_v13 = vpop.f32.mrb[34].mxu1 }
 0x2a9   : > { %v1388_v61 = vadd.f32 %v2098_v13, %v1283_v35  ;;  %v1382_v17 = vpop.f32.mrb[35].mxu1  ;;  %v1303_v18 = vadd.f32 %v1968_v10, %v1198_v0  ;;  %v1549_v35 = vld [vmem:[%s2921_s20 + $0x10] sm:$0xff] }
 0x2aa   : > { %v1383_v20 = vadd.f32 %v1382_v17, %v1278_v27  ;;  %2137 = vmatprep.mubr.f32.mxu0 %v1411_v12  ;;  %v1553_v0 = vld [vmem:[%s2921_s20 + $0x30] sm:$0xff] }
 0x2ab   : > { %2138 = vmatmul.mubr.f32.vlgmr.msra.gmra.mrb[40].mxu0 %v1412_v15  ;;  %v1414_v11 = vmax.f32 %v1388_v61, 0.0 }
 0x2ac   : > { %v1413_v21 = vmax.f32 %v1383_v20, 0.0  ;;  %v2101_v22 = vpop.f32.mrb[36].mxu1 }
 0x2ad   : > { %v1398_v23 = vadd.f32 %v2101_v22, %v1293_v44  ;;  %v1392_v25 = vpop.f32.mrb[37].mxu1  ;;  %v1554_v44 = vld [vmem:[%s2921_s20 + $0x38] sm:$0xff]  ;;  %s2668_s20 = smov [#allocation12]  }
 0x2ae   : > { %v1393_v26 = vadd.f32 %v1392_v25, %v1288_v39  ;;  %2140 = vmatprep.mubr.f32.mxu0 %v1413_v21  ;;  %s2589_s30 = sshll.u32 %s2668_s20, 4  ;;  %s2590_s30 = int_to_ptr.vmem [resolvable:$false] %s2589_s30 }
 0x2af   : > { %2141 = vmatmul.mubr.f32.gmra.mrb[42].mxu0 %v1414_v11  ;;  %v1416_v33 = vmax.f32 %v1398_v23, 0.0  ;;  %s2591_s13 = scalar_lea.vmem %s2590_s30, 2048  ;;  %p2592_p1 = scmp.lt.s32.totalorder %s3098_s21, %s2590_s30 }
 0x2b0   : > { %v1415_v24 = vmax.f32 %v1393_v26, 0.0  ;;  %v2104_v30 = vpop.f32.mrb[38].mxu1  ;;  %p2593_p2 = scmp.lt.s32.totalorder %s2591_s13, %s2585_s11 }
 0x2b1   : > { %v1408_v56 = vadd.f32 %v2104_v30, %v1303_v18  ;;  %v1402_v8 = vpop.f32.mrb[39].mxu1 }
 0x2b2   : > { %v1403_v63 = vadd.f32 %v1402_v8, %v1298_v6  ;;  %2143 = vmatprep.mubr.f32.mxu1 %v1415_v24  ;;  %p2594_p4 = por %p2593_p2, %p2592_p1 }
 0x2b3   : > { %2144 = vmatmul.mubr.f32.vlgmr.msra.gmra.mrb[40].mxu1 %v1416_v33  ;;  %v1418_v34 = vmax.f32 %v1408_v56, 0.0 }
 0x2b4   : > { %v1417_v19 = vmax.f32 %v1403_v63, 0.0  ;;  %p2595_p10 = pnand %p2594_p4, %p2588_p13 }
 0x2b6   : > { %2146 = vmatprep.mubr.f32.mxu1 %v1417_v19 }
 0x2b7   : > { %2147 = vmatmul.mubr.f32.gmra.mrb[42].mxu1 %v1418_v34 }
 0x37e   : > { %v2139_v28 = vpop.f32.mrb[40].mxu0 }
 0x37f   : > { %v1514_v32 = vadd.f32 %v2139_v28, %v1713_v62  ;;  %v1508_v36 = vpop.f32.mrb[41].mxu0 }
 0x380   : > { %v1509_v27 = vadd.f32 %v1713_v62, %v1508_v36 }
 0x381   : > { %v1556_v37 = vadd.f32 %v1548_v5, %v1514_v32 }
 0x382   : > { %v1555_v38 = vadd.f32 %v1547_v4, %v1509_v27  ;;  %v2142_v16 = vpop.f32.mrb[42].mxu0 }
 0x383   : > { %v1564_v40 = vmax.f32 %v1556_v37, 0.0  ;;  %v1524_v29 = vadd.f32 %v2142_v16, %v1713_v62  ;;  %v1518_v31 = vpop.f32.mrb[43].mxu0 }
 0x384   : > { %v1563_v41 = vmax.f32 %v1555_v38, 0.0  ;;  %v1519_v42 = vadd.f32 %v1713_v62, %v1518_v31 }
 0x385   : > { %1572 = vst [vmem:[%s2935_s9 + $0x8] sm:$0xff] %v1564_v40  ;;  %v1558_v43 = vadd.f32 %v1550_v14, %v1524_v29 }
 0x386   : > { %1571 = vst [vmem:[%s2935_s9] sm:$0xff] %v1563_v41  ;;  %v1557_v45 = vadd.f32 %v1549_v35, %v1519_v42  ;;  %v2145_v46 = vpop.f32.mrb[40].mxu1 }
 0x387   : > { %v1566_v48 = vmax.f32 %v1558_v43, 0.0  ;;  %v1534_v39 = vadd.f32 %v2145_v46, %v1713_v62  ;;  %v1528_v49 = vpop.f32.mrb[41].mxu1 }
 0x388   : > { %v1565_v51 = vmax.f32 %v1557_v45, 0.0  ;;  %v1529_v53 = vadd.f32 %v1713_v62, %v1528_v49 }
 0x389   : > { %1574 = vst [vmem:[%s2935_s9 + $0x18] sm:$0xff] %v1566_v48  ;;  %v1560_v54 = vadd.f32 %v1552_v47, %v1534_v39 }
 0x38a   : > { %1573 = vst [vmem:[%s2935_s9 + $0x10] sm:$0xff] %v1565_v51  ;;  %v1559_v55 = vadd.f32 %v1551_v50, %v1529_v53  ;;  %v2148_v57 = vpop.f32.mrb[42].mxu1 }
 0x38b   : > { %v1568_v58 = vmax.f32 %v1560_v54, 0.0  ;;  %v1544_v59 = vadd.f32 %v2148_v57, %v1713_v62  ;;  %v1538_v60 = vpop.f32.mrb[43].mxu1 }
 0x38c   : > { %v1567_v1 = vmax.f32 %v1559_v55, 0.0  ;;  %v1539_v2 = vadd.f32 %v1713_v62, %v1538_v60 }
 0x38d   : > { %1576 = vst [vmem:[%s2935_s9 + $0x28] sm:$0xff] %v1568_v58  ;;  %v1562_v3 = vadd.f32 %v1554_v44, %v1544_v59 }
 0x38e   : > { %1575 = vst [vmem:[%s2935_s9 + $0x20] sm:$0xff] %v1567_v1  ;;  %v1561_v52 = vadd.f32 %v1553_v0, %v1539_v2 }
 0x38f   : > { %v1570_v6 = vmax.f32 %v1562_v3, 0.0 }
 0x390   : > { %v1569_v7 = vmax.f32 %v1561_v52, 0.0 }
 0x391   : > { %1578 = vst [vmem:[%s2935_s9 + $0x38] sm:$0xff] %v1570_v6 }
 0x392   : > { %1577 = vst [vmem:[%s2935_s9 + $0x30] sm:$0xff] %v1569_v7 }
 0x393   : > { %2598 = shalt.err (!%p2595_p10)
}
 0x394   : > { %s2599_s9 = scalar_lea.hbm %s3096_s23, 1024  ;;  %s2603_s14 = scalar_lea.hbm %s3151_s7, 2048 }
 0x395   : > { %p2600_p3 = scmp.ne.s32.totalorder %s3096_s23, %s2599_s9  ;;  %p2604_p0 = scmp.lt.u32.totalorder %s3096_s23, %s3151_s7 }
 0x396   : > { %p2605_p6 = scmp.lt.u32.totalorder %s2603_s14, %s2599_s9  ;;  %p2607_p11 = scmp.lt.u32.totalorder %s2599_s9, %s3096_s23 }
 0x397   : > { %p2601_p12 = pnand %p2600_p3, %p2866_p5 }
 0x398   : > { %p2606_p8 = por %p2605_p6, %p2604_p0 }
 0x399   : > { %p2602_p9 = pneg %p2601_p12 }
 0x39a   : > { %p2608_p7 = por %p2607_p11, %p2606_p8 }
 0x39c   : > { %p2609_p13 = pnand %p2608_p7, %p2602_p9 }
 0x39e   : > { %2612 = shalt.err (!%p2609_p13)
}
 0x39f   : > { %s2669_s16 = smov 128   ;;  %s2670_s29 = smov 8  }
 0x3a0   : > { %2403 = dma.vmem_to_hbm [thread:$0]  (%p2866_p5), %s3098_s21, 1024, %s3096_s23, %s1580_s28, %s2669_s16, %s2669_s16, %s2670_s29  }
 0x3a1 PF: > { %s3172_s11 = sld [smem:[#allocation17_spill]]  ;;  %s1608_s20 = sand.u32 1, %s2647_s24  }
 0x3a2   : > { %p3174_p2 = scmp.ge.s32.totalorder %s2659_s27, 2  ;;  %s1609_s30 = scalar_lea.sflag [#allocation6], %s1608_s20 }
 0x3a7   : > { %p3173_p1 = scmp.ne.s32.totalorder %s3172_s11, 0 }
 0x3a9   : > { %p2420_p4 = pnand %p3174_p2, %p3173_p1 }
 0x3ab   : > { %2642 = dma.done.wait (!%p2420_p4), %s1609_s30, 1024  }
 0x3ac   : > { %2644 = vsyncadd (!%p2420_p4), %s1609_s30, 4294966272  ;;  %p22_p10 = scmp.ge.s32.totalorder %s2852_s22, 4   ;;  %s3175_s24 = smov %s2651_s25 }
 0x3ad   : > { %s3176_s25 = smov %s2655_s26  ;;  %s3177_s26 = smov %s2862_s18 }
 0x3ae   : > { %s3178_s27 = smov %s2852_s22  ;;  %24 = sbr.rel (!%p22_p10) target bundleno = 7 (0x7), region = 111 }
 0x3b5   :  { %1614 = vsyncpa [#allocation5], 1 }
 0x3b6   :  { %1616 = vsyncpa [#allocation5 + $0x1], 1 }
 0x3b7   :  { %1617 = vsyncpa [#allocation8], 1 }
 0x3b8   :  { %1618 = vsyncpa [#allocation11], 1 }
 0x3b9   :  { %1619 = vsyncpa [#allocation6], 1 }
 0x3ba   :  { %1621 = vsyncpa [#allocation6 + $0x1], 1 }

</bundles_post_ra>
